<compile_context>
chip_gen: v6e
topology: v6e:2x2x1
jax: 0.10.0
libtpu: 0.0.40
codegen_flags: <defaults>
</compile_context>

<pallas_src>
import functools

import jax
import jax.numpy as jnp
from jax import lax
from jax.experimental import pallas as pl
from jax.experimental.pallas import tpu as pltpu


def _key_node_kernel(w1_ref, b1_ref, w2_ref, b2_ref, x_ref, out_ref,
                     *, n, k_top, idx_bits):
    # ---- rank-1 score coefficients, computed in-kernel (once per step) -----
    w1 = w1_ref[...]          # (1, D)
    b1 = b1_ref[...]
    w2 = w2_ref[...]
    b2 = b2_ref[...]
    a = jnp.sum(w1 * w2, axis=-1, keepdims=True)   # (1,1)  w1.w2
    b = jnp.sum(w1 * b2, axis=-1, keepdims=True)   # (1,1)  w1.b2
    c = jnp.sum(b1 * w2, axis=-1, keepdims=True)   # (1,1)  b1.w2
    d = jnp.sum(b1 * b2, axis=-1, keepdims=True)   # (1,1)  b1.b2

    x = x_ref[...]                                  # (bt, n) f32
    u = a * x + b                                   # (bt, n)  lane-major (j)
    v = c * x + d                                   # (bt, n)  lane-major (j)
    # S[r,i,j] = x_i * u_j + v_j  (== X1_i . X2_j).  Only x[:, :, None] needs
    # the single sublane relayout; u/v stay lane-major.
    s = x[:, :, None] * u[:, None, :] + v[:, None, :]          # (bt, n, n)

    # softmax row sums are ~1; the reference then renormalizes by the row sum
    # (a float no-op) and sums again.  Only the row sums are needed, so the
    # relation matrix itself is never materialized:
    m = jnp.max(s, axis=-1, keepdims=True)
    e = jnp.exp(s - m)
    sum_e = jnp.sum(e, axis=-1)                                 # (bt, n)
    infl = sum_e * pl.reciprocal(sum_e, approx=True)            # (bt, n) ~ 1.0

    bt = x.shape[0]
    # ---- fused top-k + gather ----------------------------------------------
    # infl > 0 always, so its f32 bit pattern orders like the value.  Clear the
    # low `idx_bits` mantissa bits and OR in (n-1-col): one max-reduce then
    # yields both the winner and its index (lowest-index tie-break), and the
    # key is tie-free by construction.
    col = lax.broadcasted_iota(jnp.int32, (bt, n), 1)            # (bt, n)
    low_mask = (1 << idx_bits) - 1
    key_bits = ((pltpu.bitcast(infl, jnp.int32) & jnp.int32(~low_mask))
                | (jnp.int32(n - 1) - col))
    key = pltpu.bitcast(key_bits, jnp.float32)                   # (bt, n) > 0

    out_lane = lax.broadcasted_iota(jnp.int32, (bt, 2 * k_top), 1)
    packed = jnp.zeros((bt, 2 * k_top), jnp.float32)
    neg_inf = jnp.float32(-jnp.inf)
    for kk in range(k_top):          # K=10: full static unroll is fine
        mx = jnp.max(key, axis=-1, keepdims=True)                # 1 XLU reduce
        idx = jnp.int32(n - 1) - (pltpu.bitcast(mx, jnp.int32)
                                  & jnp.int32(low_mask))         # (bt, 1) i32
        hit = col == idx                                         # one-hot (bt, n)
        sel = jnp.sum(jnp.where(hit, x, 0.0),
                      axis=-1, keepdims=True)                    # (bt,1)=x[r,idx]
        packed = jnp.where(out_lane == kk, sel, packed)                     # value lanes
        packed = jnp.where(out_lane == k_top + kk,
                           idx.astype(jnp.float32), packed)                # index lanes
        key = jnp.where(hit, neg_inf, key)                       # retire winner

    # Single lane-contiguous store: [selected values | indices-as-f32].
    out_ref[...] = packed


def _pick_bt_block(bt):
    # Keep the whole problem in one step while small; for large BT use >=256
    # row blocks (multiple of 8 sublanes) so the "parallel" grid can shard
    # across v7x's two TensorCores.
    if bt <= 256:
        return bt
    for blk in (512, 256, 128, 64, 32, 16, 8):
        if bt % blk == 0:
            return blk
    return bt


def key_node_identification(input_data, w1, b1, w2, b2, K):
    """input_data: (B, T, N, 1).  Returns (selected_values, top_k_nodes)."""
    B, T, N, C = input_data.shape
    assert C == 1, "last dim must be 1 (it is the 1x1-conv channel)"
    assert K <= N
    assert N < (1 << 23), "indices are carried as f32 lanes inside the kernel"
    BT = B * T
    D = w1.shape[0]

    x2d = input_data.reshape(BT, N).astype(jnp.float32)
    # In a real module these (1, D) parameter views are stored once (cached),
    # not rebuilt per forward; the reshape here is metadata-only.
    w1r = w1.reshape(1, D).astype(jnp.float32)
    b1r = b1.reshape(1, D).astype(jnp.float32)
    w2r = w2.reshape(1, D).astype(jnp.float32)
    b2r = b2.reshape(1, D).astype(jnp.float32)

    bt_block = _pick_bt_block(BT)
    grid = (BT // bt_block,)
    idx_bits = max(1, (N - 1).bit_length())

    # Per-step working set (s/e pass dominates); leave 2x headroom, cap at the
    # smallest physical VMEM (v7x: 64 MiB).
    step_bytes = 4 * (3 * bt_block * N * N + 6 * bt_block * N
                      + 4 * bt_block * K + 8 * D)
    vmem_limit = int(min(64 * 1024 * 1024, max(4 * 1024 * 1024, 2 * step_bytes)))

    kernel = functools.partial(_key_node_kernel, n=N, k_top=K, idx_bits=idx_bits)

    packed = pl.pallas_call(
        kernel,
        out_shape=jax.ShapeDtypeStruct((BT, 2 * K), jnp.float32),
        grid=grid,
        in_specs=[
            pl.BlockSpec((1, D), lambda i: (0, 0)),          # w1
            pl.BlockSpec((1, D), lambda i: (0, 0)),          # b1
            pl.BlockSpec((1, D), lambda i: (0, 0)),          # w2
            pl.BlockSpec((1, D), lambda i: (0, 0)),          # b2
            pl.BlockSpec((bt_block, N), lambda i: (i, 0)),   # x rows
        ],
        out_specs=pl.BlockSpec((bt_block, 2 * K), lambda i: (i, 0)),
        compiler_params=pltpu.CompilerParams(
            dimension_semantics=("parallel",),
            vmem_limit_bytes=vmem_limit,
        ),
    )(w1r, b1r, w2r, b2r, x2d)

    vals = packed[:, :K]
    idx = packed[:, K:].astype(jnp.int32)    # exact: N < 2**23

    selected_values = vals.reshape(B, T, K, 1).astype(input_data.dtype)
    top_k_nodes = idx.reshape(B, T, K, 1)
    return selected_values, top_k_nodes


if __name__ == "__main__":
    K = 10
    input_dim = 32
    B, T, N = 2, 4, 16   # N >= K

    key = jax.random.PRNGKey(0)
    k_x, k_w1, k_b1, k_w2, k_b2 = jax.random.split(key, 5)

    # Conv2d(1, D, 1, 1) weights: effective per-channel scale (D,) + bias (D,)
    bound = 1.0  # fan_in = 1 for a 1x1 conv with 1 input channel
    w1 = jax.random.uniform(k_w1, (input_dim,), jnp.float32, -bound, bound)
    b1 = jax.random.uniform(k_b1, (input_dim,), jnp.float32, -bound, bound)
    w2 = jax.random.uniform(k_w2, (input_dim,), jnp.float32, -bound, bound)
    b2 = jax.random.uniform(k_b2, (input_dim,), jnp.float32, -bound, bound)

    input_data = jax.random.normal(k_x, (B, T, N, 1), jnp.float32)

    selected_values, top_k_nodes = key_node_identification(
        input_data, w1, b1, w2, b2, K)
    jax.block_until_ready((selected_values, top_k_nodes))

    assert selected_values.shape == (B, T, K, 1)
    assert top_k_nodes.shape == (B, T, K, 1)
    assert top_k_nodes.dtype == jnp.int32

    # Fused in-kernel gather must agree with gathering input_data at the
    # returned indices.
    chk = jnp.take_along_axis(input_data, top_k_nodes, axis=2)
    assert jnp.allclose(chk, selected_values)

    # Indices are valid and distinct per (b, t) row.
    idx2d = top_k_nodes.reshape(B * T, K)
    assert bool(jnp.all((idx2d >= 0) & (idx2d < N)))
    srt = jnp.sort(idx2d, axis=-1)
    assert bool(jnp.all(srt[:, 1:] != srt[:, :-1]))

    print("KERNEL_OK")
</pallas_src>

<mosaic_0001>
module attributes {stable_mosaic.version = 11 : i64} {
  func.func @_key_node_kernel(%arg0: i32, %arg1: memref<1x32xf32, #tpu.memory_space<vmem>>, %arg2: memref<1x32xf32, #tpu.memory_space<vmem>>, %arg3: memref<1x32xf32, #tpu.memory_space<vmem>>, %arg4: memref<1x32xf32, #tpu.memory_space<vmem>>, %arg5: memref<8x16xf32, #tpu.memory_space<vmem>>, %arg6: memref<8x20xf32, #tpu.memory_space<vmem>>) attributes {dimension_semantics = [#tpu.dimension_semantics<parallel>], iteration_bounds = array<i64: 1>, scalar_prefetch = 0 : i64, scratch_operands = 0 : i64, tpu.core_type = #tpu.core_type<tc>, window_params = [{pipeline_mode = #tpu.pipeline_mode<synchronous>, transform_indices = @transform_0, window_bounds = array<i64: 1, 32>}, {pipeline_mode = #tpu.pipeline_mode<synchronous>, transform_indices = @transform_1, window_bounds = array<i64: 1, 32>}, {pipeline_mode = #tpu.pipeline_mode<synchronous>, transform_indices = @transform_2, window_bounds = array<i64: 1, 32>}, {pipeline_mode = #tpu.pipeline_mode<synchronous>, transform_indices = @transform_3, window_bounds = array<i64: 1, 32>}, {transform_indices = @transform_4, window_bounds = array<i64: 8, 16>}, {transform_indices = @transform_5, window_bounds = array<i64: 8, 20>}]} {
    %c0 = arith.constant 0 : index
    %c0_0 = arith.constant 0 : index
    %0 = vector.load %arg1[%c0, %c0_0] : memref<1x32xf32, #tpu.memory_space<vmem>>, vector<1x32xf32>
    %c0_1 = arith.constant 0 : index
    %c0_2 = arith.constant 0 : index
    %1 = vector.load %arg2[%c0_1, %c0_2] : memref<1x32xf32, #tpu.memory_space<vmem>>, vector<1x32xf32>
    %c0_3 = arith.constant 0 : index
    %c0_4 = arith.constant 0 : index
    %2 = vector.load %arg3[%c0_3, %c0_4] : memref<1x32xf32, #tpu.memory_space<vmem>>, vector<1x32xf32>
    %c0_5 = arith.constant 0 : index
    %c0_6 = arith.constant 0 : index
    %3 = vector.load %arg4[%c0_5, %c0_6] : memref<1x32xf32, #tpu.memory_space<vmem>>, vector<1x32xf32>
    %4 = arith.mulf %0, %2 : vector<1x32xf32>
    %cst = arith.constant dense<0.000000e+00> : vector<1xf32>
    %5 = vector.multi_reduction <add>, %4, %cst [1] : vector<1x32xf32> to vector<1xf32>
    %6 = vector.shape_cast %5 : vector<1xf32> to vector<1x1xf32>
    %7 = arith.mulf %0, %3 : vector<1x32xf32>
    %cst_7 = arith.constant dense<0.000000e+00> : vector<1xf32>
    %8 = vector.multi_reduction <add>, %7, %cst_7 [1] : vector<1x32xf32> to vector<1xf32>
    %9 = vector.shape_cast %8 : vector<1xf32> to vector<1x1xf32>
    %10 = arith.mulf %1, %2 : vector<1x32xf32>
    %cst_8 = arith.constant dense<0.000000e+00> : vector<1xf32>
    %11 = vector.multi_reduction <add>, %10, %cst_8 [1] : vector<1x32xf32> to vector<1xf32>
    %12 = vector.shape_cast %11 : vector<1xf32> to vector<1x1xf32>
    %13 = arith.mulf %1, %3 : vector<1x32xf32>
    %cst_9 = arith.constant dense<0.000000e+00> : vector<1xf32>
    %14 = vector.multi_reduction <add>, %13, %cst_9 [1] : vector<1x32xf32> to vector<1xf32>
    %15 = vector.shape_cast %14 : vector<1xf32> to vector<1x1xf32>
    %c0_10 = arith.constant 0 : index
    %c0_11 = arith.constant 0 : index
    %16 = vector.load %arg5[%c0_10, %c0_11] : memref<8x16xf32, #tpu.memory_space<vmem>>, vector<8x16xf32>
    %17 = vector.broadcast %6 : vector<1x1xf32> to vector<8x16xf32>
    %18 = arith.mulf %17, %16 : vector<8x16xf32>
    %19 = vector.broadcast %9 : vector<1x1xf32> to vector<8x16xf32>
    %20 = arith.addf %18, %19 : vector<8x16xf32>
    %21 = vector.broadcast %12 : vector<1x1xf32> to vector<8x16xf32>
    %22 = arith.mulf %21, %16 : vector<8x16xf32>
    %23 = vector.broadcast %15 : vector<1x1xf32> to vector<8x16xf32>
    %24 = arith.addf %22, %23 : vector<8x16xf32>
    %25 = vector.shape_cast %16 : vector<8x16xf32> to vector<8x16x1xf32>
    %26 = vector.shape_cast %20 : vector<8x16xf32> to vector<8x1x16xf32>
    %27 = vector.broadcast %25 : vector<8x16x1xf32> to vector<8x16x16xf32>
    %28 = vector.broadcast %26 : vector<8x1x16xf32> to vector<8x16x16xf32>
    %29 = arith.mulf %27, %28 : vector<8x16x16xf32>
    %30 = vector.shape_cast %24 : vector<8x16xf32> to vector<8x1x16xf32>
    %31 = vector.broadcast %30 : vector<8x1x16xf32> to vector<8x16x16xf32>
    %32 = arith.addf %29, %31 : vector<8x16x16xf32>
    %cst_12 = arith.constant dense<0xFF800000> : vector<8x16xf32>
    %33 = vector.multi_reduction <maximumf>, %32, %cst_12 [2] : vector<8x16x16xf32> to vector<8x16xf32>
    %34 = vector.shape_cast %33 : vector<8x16xf32> to vector<8x16x1xf32>
    %35 = vector.broadcast %34 : vector<8x16x1xf32> to vector<8x16x16xf32>
    %36 = arith.subf %32, %35 : vector<8x16x16xf32>
    %37 = math.exp %36 : vector<8x16x16xf32>
    %cst_13 = arith.constant dense<0.000000e+00> : vector<8x16xf32>
    %38 = vector.multi_reduction <add>, %37, %cst_13 [2] : vector<8x16x16xf32> to vector<8x16xf32>
    %39 = tpu.reciprocal %38 {approx = true} : vector<8x16xf32> -> vector<8x16xf32>
    %40 = arith.mulf %38, %39 : vector<8x16xf32>
    %41 = tpu.iota {dimensions = array<i32: 1>} : vector<8x16xi32>
    %42 = tpu.bitcast %40 : vector<8x16xf32> -> vector<8x16xi32>
    %c-16_i32 = arith.constant -16 : i32
    %43 = vector.broadcast %c-16_i32 : i32 to vector<8x16xi32>
    %44 = arith.andi %42, %43 : vector<8x16xi32>
    %c15_i32 = arith.constant 15 : i32
    %45 = vector.broadcast %c15_i32 : i32 to vector<8x16xi32>
    %46 = arith.subi %45, %41 : vector<8x16xi32>
    %47 = arith.ori %44, %46 : vector<8x16xi32>
    %48 = tpu.bitcast %47 : vector<8x16xi32> -> vector<8x16xf32>
    %49 = tpu.iota {dimensions = array<i32: 1>} : vector<8x20xi32>
    %cst_14 = arith.constant 0.000000e+00 : f32
    %50 = vector.broadcast %cst_14 : f32 to vector<8x20xf32>
    %cst_15 = arith.constant dense<0xFF800000> : vector<8xf32>
    %51 = vector.multi_reduction <maximumf>, %48, %cst_15 [1] : vector<8x16xf32> to vector<8xf32>
    %52 = vector.shape_cast %51 : vector<8xf32> to vector<8x1xf32>
    %53 = tpu.bitcast %52 : vector<8x1xf32> -> vector<8x1xi32>
    %c15_i32_16 = arith.constant 15 : i32
    %54 = vector.broadcast %c15_i32_16 : i32 to vector<8x1xi32>
    %55 = arith.andi %53, %54 : vector<8x1xi32>
    %c15_i32_17 = arith.constant 15 : i32
    %56 = vector.broadcast %c15_i32_17 : i32 to vector<8x1xi32>
    %57 = arith.subi %56, %55 : vector<8x1xi32>
    %58 = vector.broadcast %57 : vector<8x1xi32> to vector<8x16xi32>
    %59 = arith.cmpi eq, %41, %58 : vector<8x16xi32>
    %cst_18 = arith.constant 0.000000e+00 : f32
    %60 = vector.broadcast %cst_18 : f32 to vector<8x16xf32>
    %61 = arith.select %59, %16, %60 : vector<8x16xi1>, vector<8x16xf32>
    %cst_19 = arith.constant dense<0.000000e+00> : vector<8xf32>
    %62 = vector.multi_reduction <add>, %61, %cst_19 [1] : vector<8x16xf32> to vector<8xf32>
    %63 = vector.shape_cast %62 : vector<8xf32> to vector<8x1xf32>
    %c0_i32 = arith.constant 0 : i32
    %64 = vector.broadcast %c0_i32 : i32 to vector<8x20xi32>
    %65 = arith.cmpi eq, %49, %64 : vector<8x20xi32>
    %66 = vector.shape_cast %63 : vector<8x1xf32> to vector<8x1xf32>
    %67 = vector.broadcast %66 : vector<8x1xf32> to vector<8x20xf32>
    %68 = arith.select %65, %67, %50 : vector<8x20xi1>, vector<8x20xf32>
    %c10_i32 = arith.constant 10 : i32
    %69 = vector.broadcast %c10_i32 : i32 to vector<8x20xi32>
    %70 = arith.cmpi eq, %49, %69 : vector<8x20xi32>
    %71 = arith.sitofp %57 : vector<8x1xi32> to vector<8x1xf32>
    %72 = vector.shape_cast %71 : vector<8x1xf32> to vector<8x1xf32>
    %73 = vector.broadcast %72 : vector<8x1xf32> to vector<8x20xf32>
    %74 = arith.select %70, %73, %68 : vector<8x20xi1>, vector<8x20xf32>
    %cst_20 = arith.constant 0xFF800000 : f32
    %75 = vector.broadcast %cst_20 : f32 to vector<8x16xf32>
    %76 = arith.select %59, %75, %48 : vector<8x16xi1>, vector<8x16xf32>
    %cst_21 = arith.constant dense<0xFF800000> : vector<8xf32>
    %77 = vector.multi_reduction <maximumf>, %76, %cst_21 [1] : vector<8x16xf32> to vector<8xf32>
    %78 = vector.shape_cast %77 : vector<8xf32> to vector<8x1xf32>
    %79 = tpu.bitcast %78 : vector<8x1xf32> -> vector<8x1xi32>
    %c15_i32_22 = arith.constant 15 : i32
    %80 = vector.broadcast %c15_i32_22 : i32 to vector<8x1xi32>
    %81 = arith.andi %79, %80 : vector<8x1xi32>
    %c15_i32_23 = arith.constant 15 : i32
    %82 = vector.broadcast %c15_i32_23 : i32 to vector<8x1xi32>
    %83 = arith.subi %82, %81 : vector<8x1xi32>
    %84 = vector.broadcast %83 : vector<8x1xi32> to vector<8x16xi32>
    %85 = arith.cmpi eq, %41, %84 : vector<8x16xi32>
    %cst_24 = arith.constant 0.000000e+00 : f32
    %86 = vector.broadcast %cst_24 : f32 to vector<8x16xf32>
    %87 = arith.select %85, %16, %86 : vector<8x16xi1>, vector<8x16xf32>
    %cst_25 = arith.constant dense<0.000000e+00> : vector<8xf32>
    %88 = vector.multi_reduction <add>, %87, %cst_25 [1] : vector<8x16xf32> to vector<8xf32>
    %89 = vector.shape_cast %88 : vector<8xf32> to vector<8x1xf32>
    %c1_i32 = arith.constant 1 : i32
    %90 = vector.broadcast %c1_i32 : i32 to vector<8x20xi32>
    %91 = arith.cmpi eq, %49, %90 : vector<8x20xi32>
    %92 = vector.shape_cast %89 : vector<8x1xf32> to vector<8x1xf32>
    %93 = vector.broadcast %92 : vector<8x1xf32> to vector<8x20xf32>
    %94 = arith.select %91, %93, %74 : vector<8x20xi1>, vector<8x20xf32>
    %c11_i32 = arith.constant 11 : i32
    %95 = vector.broadcast %c11_i32 : i32 to vector<8x20xi32>
    %96 = arith.cmpi eq, %49, %95 : vector<8x20xi32>
    %97 = arith.sitofp %83 : vector<8x1xi32> to vector<8x1xf32>
    %98 = vector.shape_cast %97 : vector<8x1xf32> to vector<8x1xf32>
    %99 = vector.broadcast %98 : vector<8x1xf32> to vector<8x20xf32>
    %100 = arith.select %96, %99, %94 : vector<8x20xi1>, vector<8x20xf32>
    %cst_26 = arith.constant 0xFF800000 : f32
    %101 = vector.broadcast %cst_26 : f32 to vector<8x16xf32>
    %102 = arith.select %85, %101, %76 : vector<8x16xi1>, vector<8x16xf32>
    %cst_27 = arith.constant dense<0xFF800000> : vector<8xf32>
    %103 = vector.multi_reduction <maximumf>, %102, %cst_27 [1] : vector<8x16xf32> to vector<8xf32>
    %104 = vector.shape_cast %103 : vector<8xf32> to vector<8x1xf32>
    %105 = tpu.bitcast %104 : vector<8x1xf32> -> vector<8x1xi32>
    %c15_i32_28 = arith.constant 15 : i32
    %106 = vector.broadcast %c15_i32_28 : i32 to vector<8x1xi32>
    %107 = arith.andi %105, %106 : vector<8x1xi32>
    %c15_i32_29 = arith.constant 15 : i32
    %108 = vector.broadcast %c15_i32_29 : i32 to vector<8x1xi32>
    %109 = arith.subi %108, %107 : vector<8x1xi32>
    %110 = vector.broadcast %109 : vector<8x1xi32> to vector<8x16xi32>
    %111 = arith.cmpi eq, %41, %110 : vector<8x16xi32>
    %cst_30 = arith.constant 0.000000e+00 : f32
    %112 = vector.broadcast %cst_30 : f32 to vector<8x16xf32>
    %113 = arith.select %111, %16, %112 : vector<8x16xi1>, vector<8x16xf32>
    %cst_31 = arith.constant dense<0.000000e+00> : vector<8xf32>
    %114 = vector.multi_reduction <add>, %113, %cst_31 [1] : vector<8x16xf32> to vector<8xf32>
    %115 = vector.shape_cast %114 : vector<8xf32> to vector<8x1xf32>
    %c2_i32 = arith.constant 2 : i32
    %116 = vector.broadcast %c2_i32 : i32 to vector<8x20xi32>
    %117 = arith.cmpi eq, %49, %116 : vector<8x20xi32>
    %118 = vector.shape_cast %115 : vector<8x1xf32> to vector<8x1xf32>
    %119 = vector.broadcast %118 : vector<8x1xf32> to vector<8x20xf32>
    %120 = arith.select %117, %119, %100 : vector<8x20xi1>, vector<8x20xf32>
    %c12_i32 = arith.constant 12 : i32
    %121 = vector.broadcast %c12_i32 : i32 to vector<8x20xi32>
    %122 = arith.cmpi eq, %49, %121 : vector<8x20xi32>
    %123 = arith.sitofp %109 : vector<8x1xi32> to vector<8x1xf32>
    %124 = vector.shape_cast %123 : vector<8x1xf32> to vector<8x1xf32>
    %125 = vector.broadcast %124 : vector<8x1xf32> to vector<8x20xf32>
    %126 = arith.select %122, %125, %120 : vector<8x20xi1>, vector<8x20xf32>
    %cst_32 = arith.constant 0xFF800000 : f32
    %127 = vector.broadcast %cst_32 : f32 to vector<8x16xf32>
    %128 = arith.select %111, %127, %102 : vector<8x16xi1>, vector<8x16xf32>
    %cst_33 = arith.constant dense<0xFF800000> : vector<8xf32>
    %129 = vector.multi_reduction <maximumf>, %128, %cst_33 [1] : vector<8x16xf32> to vector<8xf32>
    %130 = vector.shape_cast %129 : vector<8xf32> to vector<8x1xf32>
    %131 = tpu.bitcast %130 : vector<8x1xf32> -> vector<8x1xi32>
    %c15_i32_34 = arith.constant 15 : i32
    %132 = vector.broadcast %c15_i32_34 : i32 to vector<8x1xi32>
    %133 = arith.andi %131, %132 : vector<8x1xi32>
    %c15_i32_35 = arith.constant 15 : i32
    %134 = vector.broadcast %c15_i32_35 : i32 to vector<8x1xi32>
    %135 = arith.subi %134, %133 : vector<8x1xi32>
    %136 = vector.broadcast %135 : vector<8x1xi32> to vector<8x16xi32>
    %137 = arith.cmpi eq, %41, %136 : vector<8x16xi32>
    %cst_36 = arith.constant 0.000000e+00 : f32
    %138 = vector.broadcast %cst_36 : f32 to vector<8x16xf32>
    %139 = arith.select %137, %16, %138 : vector<8x16xi1>, vector<8x16xf32>
    %cst_37 = arith.constant dense<0.000000e+00> : vector<8xf32>
    %140 = vector.multi_reduction <add>, %139, %cst_37 [1] : vector<8x16xf32> to vector<8xf32>
    %141 = vector.shape_cast %140 : vector<8xf32> to vector<8x1xf32>
    %c3_i32 = arith.constant 3 : i32
    %142 = vector.broadcast %c3_i32 : i32 to vector<8x20xi32>
    %143 = arith.cmpi eq, %49, %142 : vector<8x20xi32>
    %144 = vector.shape_cast %141 : vector<8x1xf32> to vector<8x1xf32>
    %145 = vector.broadcast %144 : vector<8x1xf32> to vector<8x20xf32>
    %146 = arith.select %143, %145, %126 : vector<8x20xi1>, vector<8x20xf32>
    %c13_i32 = arith.constant 13 : i32
    %147 = vector.broadcast %c13_i32 : i32 to vector<8x20xi32>
    %148 = arith.cmpi eq, %49, %147 : vector<8x20xi32>
    %149 = arith.sitofp %135 : vector<8x1xi32> to vector<8x1xf32>
    %150 = vector.shape_cast %149 : vector<8x1xf32> to vector<8x1xf32>
    %151 = vector.broadcast %150 : vector<8x1xf32> to vector<8x20xf32>
    %152 = arith.select %148, %151, %146 : vector<8x20xi1>, vector<8x20xf32>
    %cst_38 = arith.constant 0xFF800000 : f32
    %153 = vector.broadcast %cst_38 : f32 to vector<8x16xf32>
    %154 = arith.select %137, %153, %128 : vector<8x16xi1>, vector<8x16xf32>
    %cst_39 = arith.constant dense<0xFF800000> : vector<8xf32>
    %155 = vector.multi_reduction <maximumf>, %154, %cst_39 [1] : vector<8x16xf32> to vector<8xf32>
    %156 = vector.shape_cast %155 : vector<8xf32> to vector<8x1xf32>
    %157 = tpu.bitcast %156 : vector<8x1xf32> -> vector<8x1xi32>
    %c15_i32_40 = arith.constant 15 : i32
    %158 = vector.broadcast %c15_i32_40 : i32 to vector<8x1xi32>
    %159 = arith.andi %157, %158 : vector<8x1xi32>
    %c15_i32_41 = arith.constant 15 : i32
    %160 = vector.broadcast %c15_i32_41 : i32 to vector<8x1xi32>
    %161 = arith.subi %160, %159 : vector<8x1xi32>
    %162 = vector.broadcast %161 : vector<8x1xi32> to vector<8x16xi32>
    %163 = arith.cmpi eq, %41, %162 : vector<8x16xi32>
    %cst_42 = arith.constant 0.000000e+00 : f32
    %164 = vector.broadcast %cst_42 : f32 to vector<8x16xf32>
    %165 = arith.select %163, %16, %164 : vector<8x16xi1>, vector<8x16xf32>
    %cst_43 = arith.constant dense<0.000000e+00> : vector<8xf32>
    %166 = vector.multi_reduction <add>, %165, %cst_43 [1] : vector<8x16xf32> to vector<8xf32>
    %167 = vector.shape_cast %166 : vector<8xf32> to vector<8x1xf32>
    %c4_i32 = arith.constant 4 : i32
    %168 = vector.broadcast %c4_i32 : i32 to vector<8x20xi32>
    %169 = arith.cmpi eq, %49, %168 : vector<8x20xi32>
    %170 = vector.shape_cast %167 : vector<8x1xf32> to vector<8x1xf32>
    %171 = vector.broadcast %170 : vector<8x1xf32> to vector<8x20xf32>
    %172 = arith.select %169, %171, %152 : vector<8x20xi1>, vector<8x20xf32>
    %c14_i32 = arith.constant 14 : i32
    %173 = vector.broadcast %c14_i32 : i32 to vector<8x20xi32>
    %174 = arith.cmpi eq, %49, %173 : vector<8x20xi32>
    %175 = arith.sitofp %161 : vector<8x1xi32> to vector<8x1xf32>
    %176 = vector.shape_cast %175 : vector<8x1xf32> to vector<8x1xf32>
    %177 = vector.broadcast %176 : vector<8x1xf32> to vector<8x20xf32>
    %178 = arith.select %174, %177, %172 : vector<8x20xi1>, vector<8x20xf32>
    %cst_44 = arith.constant 0xFF800000 : f32
    %179 = vector.broadcast %cst_44 : f32 to vector<8x16xf32>
    %180 = arith.select %163, %179, %154 : vector<8x16xi1>, vector<8x16xf32>
    %cst_45 = arith.constant dense<0xFF800000> : vector<8xf32>
    %181 = vector.multi_reduction <maximumf>, %180, %cst_45 [1] : vector<8x16xf32> to vector<8xf32>
    %182 = vector.shape_cast %181 : vector<8xf32> to vector<8x1xf32>
    %183 = tpu.bitcast %182 : vector<8x1xf32> -> vector<8x1xi32>
    %c15_i32_46 = arith.constant 15 : i32
    %184 = vector.broadcast %c15_i32_46 : i32 to vector<8x1xi32>
    %185 = arith.andi %183, %184 : vector<8x1xi32>
    %c15_i32_47 = arith.constant 15 : i32
    %186 = vector.broadcast %c15_i32_47 : i32 to vector<8x1xi32>
    %187 = arith.subi %186, %185 : vector<8x1xi32>
    %188 = vector.broadcast %187 : vector<8x1xi32> to vector<8x16xi32>
    %189 = arith.cmpi eq, %41, %188 : vector<8x16xi32>
    %cst_48 = arith.constant 0.000000e+00 : f32
    %190 = vector.broadcast %cst_48 : f32 to vector<8x16xf32>
    %191 = arith.select %189, %16, %190 : vector<8x16xi1>, vector<8x16xf32>
    %cst_49 = arith.constant dense<0.000000e+00> : vector<8xf32>
    %192 = vector.multi_reduction <add>, %191, %cst_49 [1] : vector<8x16xf32> to vector<8xf32>
    %193 = vector.shape_cast %192 : vector<8xf32> to vector<8x1xf32>
    %c5_i32 = arith.constant 5 : i32
    %194 = vector.broadcast %c5_i32 : i32 to vector<8x20xi32>
    %195 = arith.cmpi eq, %49, %194 : vector<8x20xi32>
    %196 = vector.shape_cast %193 : vector<8x1xf32> to vector<8x1xf32>
    %197 = vector.broadcast %196 : vector<8x1xf32> to vector<8x20xf32>
    %198 = arith.select %195, %197, %178 : vector<8x20xi1>, vector<8x20xf32>
    %c15_i32_50 = arith.constant 15 : i32
    %199 = vector.broadcast %c15_i32_50 : i32 to vector<8x20xi32>
    %200 = arith.cmpi eq, %49, %199 : vector<8x20xi32>
    %201 = arith.sitofp %187 : vector<8x1xi32> to vector<8x1xf32>
    %202 = vector.shape_cast %201 : vector<8x1xf32> to vector<8x1xf32>
    %203 = vector.broadcast %202 : vector<8x1xf32> to vector<8x20xf32>
    %204 = arith.select %200, %203, %198 : vector<8x20xi1>, vector<8x20xf32>
    %cst_51 = arith.constant 0xFF800000 : f32
    %205 = vector.broadcast %cst_51 : f32 to vector<8x16xf32>
    %206 = arith.select %189, %205, %180 : vector<8x16xi1>, vector<8x16xf32>
    %cst_52 = arith.constant dense<0xFF800000> : vector<8xf32>
    %207 = vector.multi_reduction <maximumf>, %206, %cst_52 [1] : vector<8x16xf32> to vector<8xf32>
    %208 = vector.shape_cast %207 : vector<8xf32> to vector<8x1xf32>
    %209 = tpu.bitcast %208 : vector<8x1xf32> -> vector<8x1xi32>
    %c15_i32_53 = arith.constant 15 : i32
    %210 = vector.broadcast %c15_i32_53 : i32 to vector<8x1xi32>
    %211 = arith.andi %209, %210 : vector<8x1xi32>
    %c15_i32_54 = arith.constant 15 : i32
    %212 = vector.broadcast %c15_i32_54 : i32 to vector<8x1xi32>
    %213 = arith.subi %212, %211 : vector<8x1xi32>
    %214 = vector.broadcast %213 : vector<8x1xi32> to vector<8x16xi32>
    %215 = arith.cmpi eq, %41, %214 : vector<8x16xi32>
    %cst_55 = arith.constant 0.000000e+00 : f32
    %216 = vector.broadcast %cst_55 : f32 to vector<8x16xf32>
    %217 = arith.select %215, %16, %216 : vector<8x16xi1>, vector<8x16xf32>
    %cst_56 = arith.constant dense<0.000000e+00> : vector<8xf32>
    %218 = vector.multi_reduction <add>, %217, %cst_56 [1] : vector<8x16xf32> to vector<8xf32>
    %219 = vector.shape_cast %218 : vector<8xf32> to vector<8x1xf32>
    %c6_i32 = arith.constant 6 : i32
    %220 = vector.broadcast %c6_i32 : i32 to vector<8x20xi32>
    %221 = arith.cmpi eq, %49, %220 : vector<8x20xi32>
    %222 = vector.shape_cast %219 : vector<8x1xf32> to vector<8x1xf32>
    %223 = vector.broadcast %222 : vector<8x1xf32> to vector<8x20xf32>
    %224 = arith.select %221, %223, %204 : vector<8x20xi1>, vector<8x20xf32>
    %c16_i32 = arith.constant 16 : i32
    %225 = vector.broadcast %c16_i32 : i32 to vector<8x20xi32>
    %226 = arith.cmpi eq, %49, %225 : vector<8x20xi32>
    %227 = arith.sitofp %213 : vector<8x1xi32> to vector<8x1xf32>
    %228 = vector.shape_cast %227 : vector<8x1xf32> to vector<8x1xf32>
    %229 = vector.broadcast %228 : vector<8x1xf32> to vector<8x20xf32>
    %230 = arith.select %226, %229, %224 : vector<8x20xi1>, vector<8x20xf32>
    %cst_57 = arith.constant 0xFF800000 : f32
    %231 = vector.broadcast %cst_57 : f32 to vector<8x16xf32>
    %232 = arith.select %215, %231, %206 : vector<8x16xi1>, vector<8x16xf32>
    %cst_58 = arith.constant dense<0xFF800000> : vector<8xf32>
    %233 = vector.multi_reduction <maximumf>, %232, %cst_58 [1] : vector<8x16xf32> to vector<8xf32>
    %234 = vector.shape_cast %233 : vector<8xf32> to vector<8x1xf32>
    %235 = tpu.bitcast %234 : vector<8x1xf32> -> vector<8x1xi32>
    %c15_i32_59 = arith.constant 15 : i32
    %236 = vector.broadcast %c15_i32_59 : i32 to vector<8x1xi32>
    %237 = arith.andi %235, %236 : vector<8x1xi32>
    %c15_i32_60 = arith.constant 15 : i32
    %238 = vector.broadcast %c15_i32_60 : i32 to vector<8x1xi32>
    %239 = arith.subi %238, %237 : vector<8x1xi32>
    %240 = vector.broadcast %239 : vector<8x1xi32> to vector<8x16xi32>
    %241 = arith.cmpi eq, %41, %240 : vector<8x16xi32>
    %cst_61 = arith.constant 0.000000e+00 : f32
    %242 = vector.broadcast %cst_61 : f32 to vector<8x16xf32>
    %243 = arith.select %241, %16, %242 : vector<8x16xi1>, vector<8x16xf32>
    %cst_62 = arith.constant dense<0.000000e+00> : vector<8xf32>
    %244 = vector.multi_reduction <add>, %243, %cst_62 [1] : vector<8x16xf32> to vector<8xf32>
    %245 = vector.shape_cast %244 : vector<8xf32> to vector<8x1xf32>
    %c7_i32 = arith.constant 7 : i32
    %246 = vector.broadcast %c7_i32 : i32 to vector<8x20xi32>
    %247 = arith.cmpi eq, %49, %246 : vector<8x20xi32>
    %248 = vector.shape_cast %245 : vector<8x1xf32> to vector<8x1xf32>
    %249 = vector.broadcast %248 : vector<8x1xf32> to vector<8x20xf32>
    %250 = arith.select %247, %249, %230 : vector<8x20xi1>, vector<8x20xf32>
    %c17_i32 = arith.constant 17 : i32
    %251 = vector.broadcast %c17_i32 : i32 to vector<8x20xi32>
    %252 = arith.cmpi eq, %49, %251 : vector<8x20xi32>
    %253 = arith.sitofp %239 : vector<8x1xi32> to vector<8x1xf32>
    %254 = vector.shape_cast %253 : vector<8x1xf32> to vector<8x1xf32>
    %255 = vector.broadcast %254 : vector<8x1xf32> to vector<8x20xf32>
    %256 = arith.select %252, %255, %250 : vector<8x20xi1>, vector<8x20xf32>
    %cst_63 = arith.constant 0xFF800000 : f32
    %257 = vector.broadcast %cst_63 : f32 to vector<8x16xf32>
    %258 = arith.select %241, %257, %232 : vector<8x16xi1>, vector<8x16xf32>
    %cst_64 = arith.constant dense<0xFF800000> : vector<8xf32>
    %259 = vector.multi_reduction <maximumf>, %258, %cst_64 [1] : vector<8x16xf32> to vector<8xf32>
    %260 = vector.shape_cast %259 : vector<8xf32> to vector<8x1xf32>
    %261 = tpu.bitcast %260 : vector<8x1xf32> -> vector<8x1xi32>
    %c15_i32_65 = arith.constant 15 : i32
    %262 = vector.broadcast %c15_i32_65 : i32 to vector<8x1xi32>
    %263 = arith.andi %261, %262 : vector<8x1xi32>
    %c15_i32_66 = arith.constant 15 : i32
    %264 = vector.broadcast %c15_i32_66 : i32 to vector<8x1xi32>
    %265 = arith.subi %264, %263 : vector<8x1xi32>
    %266 = vector.broadcast %265 : vector<8x1xi32> to vector<8x16xi32>
    %267 = arith.cmpi eq, %41, %266 : vector<8x16xi32>
    %cst_67 = arith.constant 0.000000e+00 : f32
    %268 = vector.broadcast %cst_67 : f32 to vector<8x16xf32>
    %269 = arith.select %267, %16, %268 : vector<8x16xi1>, vector<8x16xf32>
    %cst_68 = arith.constant dense<0.000000e+00> : vector<8xf32>
    %270 = vector.multi_reduction <add>, %269, %cst_68 [1] : vector<8x16xf32> to vector<8xf32>
    %271 = vector.shape_cast %270 : vector<8xf32> to vector<8x1xf32>
    %c8_i32 = arith.constant 8 : i32
    %272 = vector.broadcast %c8_i32 : i32 to vector<8x20xi32>
    %273 = arith.cmpi eq, %49, %272 : vector<8x20xi32>
    %274 = vector.shape_cast %271 : vector<8x1xf32> to vector<8x1xf32>
    %275 = vector.broadcast %274 : vector<8x1xf32> to vector<8x20xf32>
    %276 = arith.select %273, %275, %256 : vector<8x20xi1>, vector<8x20xf32>
    %c18_i32 = arith.constant 18 : i32
    %277 = vector.broadcast %c18_i32 : i32 to vector<8x20xi32>
    %278 = arith.cmpi eq, %49, %277 : vector<8x20xi32>
    %279 = arith.sitofp %265 : vector<8x1xi32> to vector<8x1xf32>
    %280 = vector.shape_cast %279 : vector<8x1xf32> to vector<8x1xf32>
    %281 = vector.broadcast %280 : vector<8x1xf32> to vector<8x20xf32>
    %282 = arith.select %278, %281, %276 : vector<8x20xi1>, vector<8x20xf32>
    %cst_69 = arith.constant 0xFF800000 : f32
    %283 = vector.broadcast %cst_69 : f32 to vector<8x16xf32>
    %284 = arith.select %267, %283, %258 : vector<8x16xi1>, vector<8x16xf32>
    %cst_70 = arith.constant dense<0xFF800000> : vector<8xf32>
    %285 = vector.multi_reduction <maximumf>, %284, %cst_70 [1] : vector<8x16xf32> to vector<8xf32>
    %286 = vector.shape_cast %285 : vector<8xf32> to vector<8x1xf32>
    %287 = tpu.bitcast %286 : vector<8x1xf32> -> vector<8x1xi32>
    %c15_i32_71 = arith.constant 15 : i32
    %288 = vector.broadcast %c15_i32_71 : i32 to vector<8x1xi32>
    %289 = arith.andi %287, %288 : vector<8x1xi32>
    %c15_i32_72 = arith.constant 15 : i32
    %290 = vector.broadcast %c15_i32_72 : i32 to vector<8x1xi32>
    %291 = arith.subi %290, %289 : vector<8x1xi32>
    %292 = vector.broadcast %291 : vector<8x1xi32> to vector<8x16xi32>
    %293 = arith.cmpi eq, %41, %292 : vector<8x16xi32>
    %cst_73 = arith.constant 0.000000e+00 : f32
    %294 = vector.broadcast %cst_73 : f32 to vector<8x16xf32>
    %295 = arith.select %293, %16, %294 : vector<8x16xi1>, vector<8x16xf32>
    %cst_74 = arith.constant dense<0.000000e+00> : vector<8xf32>
    %296 = vector.multi_reduction <add>, %295, %cst_74 [1] : vector<8x16xf32> to vector<8xf32>
    %297 = vector.shape_cast %296 : vector<8xf32> to vector<8x1xf32>
    %c9_i32 = arith.constant 9 : i32
    %298 = vector.broadcast %c9_i32 : i32 to vector<8x20xi32>
    %299 = arith.cmpi eq, %49, %298 : vector<8x20xi32>
    %300 = vector.shape_cast %297 : vector<8x1xf32> to vector<8x1xf32>
    %301 = vector.broadcast %300 : vector<8x1xf32> to vector<8x20xf32>
    %302 = arith.select %299, %301, %282 : vector<8x20xi1>, vector<8x20xf32>
    %c19_i32 = arith.constant 19 : i32
    %303 = vector.broadcast %c19_i32 : i32 to vector<8x20xi32>
    %304 = arith.cmpi eq, %49, %303 : vector<8x20xi32>
    %305 = arith.sitofp %291 : vector<8x1xi32> to vector<8x1xf32>
    %306 = vector.shape_cast %305 : vector<8x1xf32> to vector<8x1xf32>
    %307 = vector.broadcast %306 : vector<8x1xf32> to vector<8x20xf32>
    %308 = arith.select %304, %307, %302 : vector<8x20xi1>, vector<8x20xf32>
    %c0_75 = arith.constant 0 : index
    %c0_76 = arith.constant 0 : index
    %309 = vector.load %arg6[%c0_75, %c0_76] : memref<8x20xf32, #tpu.memory_space<vmem>>, vector<8x20xf32>
    tpu.vector_store %arg6[%c0_75, %c0_76], %308 {strides = array<i32>} : memref<8x20xf32, #tpu.memory_space<vmem>>, vector<8x20xf32>,
    return
  }
  func.func @transform_0(%arg0: i32) -> (i32, i32) {
    %c0_i32 = arith.constant 0 : i32
    %c0_i32_0 = arith.constant 0 : i32
    %c0_i32_1 = arith.constant 0 : i32
    return %c0_i32, %c0_i32_0 : i32, i32
  }
  func.func @transform_1(%arg0: i32) -> (i32, i32) {
    %c0_i32 = arith.constant 0 : i32
    %c0_i32_0 = arith.constant 0 : i32
    %c0_i32_1 = arith.constant 0 : i32
    return %c0_i32, %c0_i32_0 : i32, i32
  }
  func.func @transform_2(%arg0: i32) -> (i32, i32) {
    %c0_i32 = arith.constant 0 : i32
    %c0_i32_0 = arith.constant 0 : i32
    %c0_i32_1 = arith.constant 0 : i32
    return %c0_i32, %c0_i32_0 : i32, i32
  }
  func.func @transform_3(%arg0: i32) -> (i32, i32) {
    %c0_i32 = arith.constant 0 : i32
    %c0_i32_0 = arith.constant 0 : i32
    %c0_i32_1 = arith.constant 0 : i32
    return %c0_i32, %c0_i32_0 : i32, i32
  }
  func.func @transform_4(%arg0: i32) -> (i32, i32) {
    %c0_i32 = arith.constant 0 : i32
    %c0_i32_0 = arith.constant 0 : i32
    return %arg0, %c0_i32 : i32, i32
  }
  func.func @transform_5(%arg0: i32) -> (i32, i32) {
    %c0_i32 = arith.constant 0 : i32
    %c0_i32_0 = arith.constant 0 : i32
    return %arg0, %c0_i32 : i32, i32
  }
}

</mosaic_0001>

<bundles_post_ra>
// kernel: tpu_custom_call.1
= control target key start
LH: loop header
LB: loop body
LE: loop exit
PB: predicated region body
PF: predicated region fallthrough
CT: control target
= control target key end

     0   :  { %10 = vsyncpa [#allocation3], 0  ;;  %s1466_s0 = inlined_call_operand.hbm [shape: f32[1,32], index: 0, kind: input, shape index: {}]   ;;  %s1467_s1 = inlined_call_operand.vmem [shape: f32[1,32], index: 1, kind: input, shape index: {}]   ;;  %s1468_s2 = inlined_call_operand.vmem [shape: f32[1,32], index: 2, kind: input, shape index: {}]   ;;  %s1469_s3 = inlined_call_operand.vmem [shape: f32[1,32], index: 3, kind: input, shape index: {}]   ;;  %s1470_s4 = inlined_call_operand.hbm [shape: f32[8,16], index: 4, kind: input, shape index: {}]   ;;  %s1471_s5 = inlined_call_operand.hbm [shape: f32[8,20], index: 5, kind: output, shape index: {}]  }
   0x1   :  { %11 = vsyncpa [#allocation6], 0 }
   0x2   :  { %12 = vsyncpa [#allocation4], 0  ;;  %s1084_s18 = smov [#allocation2]   ;;  %s1085_s20 = smov [#allocation5]  }
   0x3   :  { %s19_s19 = sshll.u32 %s1084_s18, 4  ;;  %s35_s21 = sshll.u32 %s1085_s20, 4  ;;  %s20_s19 = int_to_ptr.vmem [resolvable:$true] %s19_s19  ;;  %s36_s21 = int_to_ptr.vmem [resolvable:$true] %s35_s21 }
   0x4   :  { %s1026_s22 = scalar_lea.vmem %s20_s19, 16  ;;  %s1030_s23 = scalar_lea.vmem %s20_s19, 32 }
   0x5   :  { %p1027_p0 = scmp.ne.s32.totalorder %s20_s19, %s1026_s22  ;;  %p1031_p1 = scmp.lt.s32.totalorder %s20_s19, %s20_s19 }
   0x6   :  { %p1032_p2 = scmp.lt.s32.totalorder %s1030_s23, %s1026_s22 }
   0x8   :  { %p1033_p3 = por %p1032_p2, %p1031_p1 }
   0xa   :  { %p1034_p4 = pnand %p1033_p3, %p1027_p0 }
   0xc   :  { %1037 = shalt.err (!%p1034_p4)
}
   0xd   :  { %22 = dma.hbm_to_vmem [thread:$0]  %s1466_s0, 16, %s20_s19, [#allocation3]  }
   0xe   :  { %s1046_s26 = scalar_lea.vmem %s36_s21, 128  ;;  %p1051_p6 = scmp.lt.s32.totalorder %s36_s21, %s36_s21 }
   0xf   :  { %p1047_p5 = scmp.ne.s32.totalorder %s36_s21, %s1046_s26  ;;  %p1052_p7 = scmp.lt.s32.totalorder %s1046_s26, %s1046_s26 }
  0x11   :  { %p1053_p8 = por %p1052_p7, %p1051_p6 }
  0x13   :  { %p1054_p9 = pnand %p1053_p8, %p1047_p5 }
  0x15   :  { %1057 = shalt.err (!%p1054_p9)
}
  0x16   :  { %38 = dma.hbm_to_vmem [thread:$0]  %s1470_s4, 128, %s36_s21, [#allocation6]  }
  0x17   :  { %1078 = dma.done.wait [#allocation3], 16  }
  0x18   :  { %1079 = vsyncadd [#allocation3], 4294967280 }
  0x19   :  { %1080 = dma.done.wait [#allocation6], 128  }
  0x1a   :  { %1081 = vsyncadd [#allocation6], 4294967168  ;;  %v46_v0 = vld [vmem:[%s1467_s1] sm:$0x1]  ;;  %vm50_vm0 = vcmask 253952   ;;  %v67_v12 = vlaneseq  ;;  %v66_v15 = vld [vmem:[#allocation5] sm:$0xff] }
  0x1b   :  { %v47_v1 = vld [vmem:[%s1468_s2] sm:$0x1]  ;;  %v1086_v31 = vmov 1966171168   ;;  %vm387_vm1 = vcmask 130048   ;;  %vm679_vm2 = vcmask 130112  }
  0x1c   :  { %v58_v2 = vmul.f32 %v47_v1, %v46_v0  ;;  %v45_v3 = vld [vmem:[#allocation2] sm:$0x1]  ;;  %v1135_v13 = vshrl.u32 %v67_v12, 7  ;;  %v178_v32 = vunpack.c.l.s4 %v1086_v31  ;;  %vm744_vm3 = vcmask 1041409   ;;  %s1088_s1 = smov [#allocation7]  }
  0x1d   :  { %v48_v4 = vld [vmem:[%s1469_s3] sm:$0x1]  ;;  %v49_v5 = vmul.f32 %v47_v1, %v45_v3  ;;  %vm746_vm4 = vcmask 1042434   ;;  %vm748_vm5 = vcmask 1043459   ;;  %vm750_vm6 = vcmask 1044484   ;;  %s936_s2 = sshll.u32 %s1088_s1, 4  ;;  %s937_s2 = int_to_ptr.vmem [resolvable:$true] %s936_s2 }
  0x1e   :  { %v62_v6 = vmul.f32 %v48_v4, %v46_v0  ;;  %v54_v7 = vmul.f32 %v48_v4, %v45_v3  ;;  %v59_v8 = vsel %vm50_vm0, %v58_v2, 0.0  ;;  %v1138_v14 = vsub.s32 0, %v1135_v13  ;;  %s1058_s3 = scalar_lea.vmem %s937_s2, 128  ;;  %p1063_p11 = scmp.lt.s32.totalorder %s937_s2, %s937_s2 }
  0x1f   :  { %60 = vadd.xlane.f32.xlu1 %v59_v8  ;;  %v51_v9 = vsel %vm50_vm0, %v49_v5, 0.0  ;;  %v100_v17 = vsub.s32 1, %v1135_v13  ;;  %v111_v19 = vsub.s32 2, %v1135_v13  ;;  %v122_v21 = vsub.s32 3, %v1135_v13  ;;  %p1059_p10 = scmp.ne.s32.totalorder %s937_s2, %s1058_s3  ;;  %p1064_p12 = scmp.lt.s32.totalorder %s1058_s3, %s1058_s3 }
  0x20   :  { %52 = vadd.xlane.f32.xlu0 %v51_v9  ;;  %v63_v10 = vsel %vm50_vm0, %v62_v6, 0.0  ;;  %v55_v11 = vsel %vm50_vm0, %v54_v7, 0.0  ;;  %v90_v16 = vrot.slane %v66_v15, %v1138_v14  ;;  %v133_v23 = vsub.s32 4, %v1135_v13 }
  0x21   :  { %v101_v18 = vrot.slane %v66_v15, %v100_v17  ;;  %v112_v20 = vrot.slane %v66_v15, %v111_v19  ;;  %v123_v22 = vrot.slane %v66_v15, %v122_v21  ;;  %v144_v25 = vsub.s32 5, %v1135_v13  ;;  %p1065_p13 = por %p1064_p12, %p1063_p11 }
  0x22   :  { %v134_v24 = vrot.slane %v66_v15, %v133_v23  ;;  %v155_v27 = vsub.s32 6, %v1135_v13  ;;  %v166_v29 = vsub.s32 7, %v1135_v13  ;;  %v179_v36 = vunpack.c.0.s8 %v178_v32 }
  0x23   :  { %64 = vadd.xlane.f32.xlu1 %v63_v10  ;;  %v145_v26 = vrot.slane %v66_v15, %v144_v25  ;;  %vm752_vm7 = vcmask 1045509   ;;  %vm754_vm8 = vcmask 1046534   ;;  %vm756_vm9 = vcmask 1047559   ;;  %p1066_p0 = pnand %p1065_p13, %p1059_p10 }
  0x24   :  { %56 = vadd.xlane.f32.xlu0 %v55_v11  ;;  %v156_v28 = vrot.slane %v66_v15, %v155_v27  ;;  %v167_v30 = vrot.slane %v66_v15, %v166_v29  ;;  %v1151_v40 = vsub.s32 %v179_v36, %v1135_v13 }
  0x34   :  { %96 = vbcast.lane.b32.xlu1 %v90_v16, 264 }
  0x38   :  { %103 = vbcast.lane.b32.xlu1 %v101_v18, 256 }
  0x3a   :  { %92 = vbcast.lane.b32.xlu0 %v90_v16, 256 }
  0x3c   :  { %107 = vbcast.lane.b32.xlu1 %v101_v18, 264 }
  0x3e   :  { %114 = vbcast.lane.b32.xlu0 %v112_v20, 256 }
  0x40   :  { %118 = vbcast.lane.b32.xlu1 %v112_v20, 264 }
  0x42   :  { %125 = vbcast.lane.b32.xlu0 %v123_v22, 256 }
  0x44   :  { %129 = vbcast.lane.b32.xlu1 %v123_v22, 264 }
  0x46   :  { %136 = vbcast.lane.b32.xlu0 %v134_v24, 256 }
  0x48   :  { %140 = vbcast.lane.b32.xlu1 %v134_v24, 264 }
  0x4a   :  { %147 = vbcast.lane.b32.xlu0 %v145_v26, 256 }
  0x4c   :  { %151 = vbcast.lane.b32.xlu1 %v145_v26, 264 }
  0x4e   :  { %158 = vbcast.lane.b32.xlu0 %v156_v28, 256 }
  0x50   :  { %162 = vbcast.lane.b32.xlu1 %v156_v28, 264 }
  0x52   :  { %169 = vbcast.lane.b32.xlu0 %v167_v30, 256 }
  0x54   :  { %173 = vbcast.lane.b32.xlu1 %v167_v30, 264 }
  0xa8   :  { %v61_v33 = vpop.xlane.xlu1 %60 }
  0xa9   :  { %v80_v34 = vrot.slane %v61_v33, %v1138_v14  ;;  %v53_v35 = vpop.xlane.xlu0 %52 }
  0xaa   :  { %v70_v37 = vrot.slane %v53_v35, %v1138_v14 }
  0xab   :  { %v81_v38 = vmul.f32 %v80_v34, %v66_v15 }
  0xac   :  { %v65_v39 = vpop.xlane.xlu1 %64  ;;  %v71_v43 = vmul.f32 %v70_v37, %v66_v15 }
  0xad   :  { %v85_v41 = vrot.slane %v65_v39, %v1138_v14  ;;  %v57_v42 = vpop.xlane.xlu0 %56 }
  0xae   :  { %v75_v44 = vrot.slane %v57_v42, %v1138_v14 }
  0xaf   :  { %v86_v45 = vadd.f32 %v85_v41, %v81_v38 }
  0xb0   :  { %v76_v46 = vadd.f32 %v75_v44, %v71_v43  ;;  %v97_v47 = vpop.permute.xlu1 %96 }
  0xb1   :  { %v289_v48 = vrot.slane %v86_v45, %v1151_v40  ;;  %v93_v49 = vpop.permute.xlu0 %92  ;;  %v282_v60 = vcombine.high %v86_v45, %v86_v45 }
  0xb2   :  { %v183_v50 = vrot.slane %v76_v46, %v1151_v40  ;;  %v176_v57 = vcombine.high %v76_v46, %v76_v46 }
  0xb3   :  { %v297_v51 = vcombine.high %v289_v48, %v289_v48  ;;  %v305_v52 = vrot.slane %v289_v48, %v1151_v40  ;;  %v296_v15 = vrot.slane %v282_v60, %v1151_v40 }
  0xb4   :  { %v199_v53 = vrot.slane %v183_v50, %v1151_v40  ;;  %v104_v54 = vpop.permute.xlu1 %103  ;;  %v191_v55 = vcombine.high %v183_v50, %v183_v50  ;;  %v190_v8 = vrot.slane %v176_v57, %v1151_v40 }
  0xb5   :  { %v115_v56 = vpop.permute.xlu0 %114  ;;  %v334_v62 = vrot.slane %v305_v52, %v1138_v14  ;;  %v319_v63 = vrot.slane %v297_v51, %v1151_v40  ;;  %v327_v4 = vcombine.high %v305_v52, %v305_v52  ;;  %v312_v30 = vrot.slane %v296_v15, %v1151_v40 }
  0xb6   :  { %v228_v58 = vrot.slane %v199_v53, %v1138_v14  ;;  %v213_v59 = vrot.slane %v191_v55, %v1151_v40  ;;  %v221_v61 = vcombine.high %v199_v53, %v199_v53  ;;  %v206_v23 = vrot.slane %v190_v8, %v1151_v40 }
  0xb7   :  { %v338_v11 = vrot.slane %v319_v63, %v1138_v14  ;;  %v342_v18 = vrot.slane %v327_v4, %v1138_v14  ;;  %v192_v25 = vcombine.high %v190_v8, %v190_v8  ;;  %v329_v37 = vcombine.high %v319_v63, %v319_v63 }
  0xb8   :  { %v266_v0 = vmul.f32 %v228_v58, %v97_v47  ;;  %v265_v1 = vmul.f32 %v228_v58, %v93_v49  ;;  %v232_v2 = vrot.slane %v213_v59, %v1138_v14  ;;  %v108_v3 = vpop.permute.xlu1 %107  ;;  %v236_v9 = vrot.slane %v221_v61, %v1138_v14 }
  0xb9   :  { %v126_v6 = vpop.permute.xlu0 %125  ;;  %v223_v24 = vcombine.high %v213_v59, %v213_v59  ;;  %v244_v34 = vrot.slane %v206_v23, %v1138_v14  ;;  %v220_v36 = vrot.slane %v192_v25, %v1151_v40  ;;  %v298_v38 = vcombine.high %v296_v15, %v296_v15 }
  0xba   :  { %v267_v5 = vmul.f32 %v232_v2, %v104_v54  ;;  %v1164_v7 = vadd.f32 %v334_v62, %v266_v0  ;;  %v1168_v10 = vadd.f32 %v334_v62, %v265_v1  ;;  %v268_v19 = vmul.f32 %v232_v2, %v108_v3 }
  0xbb   :  { %v269_v27 = vmul.f32 %v236_v9, %v115_v56  ;;  %v240_v35 = vrot.slane %v223_v24, %v1138_v14  ;;  %v350_v42 = vrot.slane %v312_v30, %v1138_v14  ;;  %v222_v48 = vcombine.high %v206_v23, %v206_v23 }
  0xbc   :  { %v119_v16 = vpop.permute.xlu1 %118  ;;  %v391_v17 = vsel %vm387_vm1, %v1164_v7, -inf  ;;  %v388_v21 = vsel %vm387_vm1, %v1168_v10, -inf  ;;  %v1177_v22 = vadd.f32 %v338_v11, %v267_v5  ;;  %v1187_v33 = vadd.f32 %v338_v11, %v268_v19 }
  0xbd   :  { %v270_v20 = vmul.f32 %v236_v9, %v119_v16  ;;  %392 = vmax.xlane.f32.xlu1 %v391_v17  ;;  %389 = vmax.xlane.f32.xlu0 %v388_v21  ;;  %v137_v28 = vpop.permute.xlu0 %136  ;;  %v1192_v41 = vadd.f32 %v342_v18, %v269_v27  ;;  %v248_v49 = vrot.slane %v220_v36, %v1138_v14 }
  0xbe   :  { %v394_v31 = vsel %vm387_vm1, %v1177_v22, -inf  ;;  %v273_v43 = vmul.f32 %v244_v34, %v137_v28  ;;  %v397_v46 = vsel %vm387_vm1, %v1187_v33, -inf  ;;  %v346_v51 = vrot.slane %v329_v37, %v1138_v14 }
  0xbf   :  { %v1180_v26 = vadd.f32 %v342_v18, %v270_v20  ;;  %v326_v52 = vrot.slane %v298_v38, %v1151_v40  ;;  %v271_v53 = vmul.f32 %v240_v35, %v126_v6  ;;  %v400_v55 = vsel %vm387_vm1, %v1192_v41, -inf }
  0xc0   :  { %v130_v29 = vpop.permute.xlu1 %129  ;;  %v1206_v58 = vadd.f32 %v350_v42, %v273_v43  ;;  %v252_v60 = vrot.slane %v222_v48, %v1138_v14  ;;  %v224_v61 = vcombine.high %v220_v36, %v220_v36  ;;  %v328_v62 = vcombine.high %v312_v30, %v312_v30 }
  0xc1   :  { %v403_v32 = vsel %vm387_vm1, %v1180_v26, -inf  ;;  %395 = vmax.xlane.f32.xlu0 %v394_v31  ;;  %v272_v44 = vmul.f32 %v240_v35, %v130_v29  ;;  %v148_v47 = vpop.permute.xlu0 %147  ;;  %v354_v40 = vrot.slane %v326_v52, %v1138_v14  ;;  %v1212_v2 = vadd.f32 %v346_v51, %v271_v53 }
  0xc2   :  { %404 = vmax.xlane.f32.xlu1 %v403_v32  ;;  %v275_v63 = vmul.f32 %v248_v49, %v148_v47  ;;  %v412_v4 = vsel %vm387_vm1, %v1206_v58, -inf  ;;  %v256_v8 = vrot.slane %v224_v61, %v1138_v14  ;;  %v358_v9 = vrot.slane %v328_v62, %v1138_v14 }
  0xc3   :  { %v1208_v59 = vadd.f32 %v346_v51, %v272_v44  ;;  %v330_v11 = vcombine.high %v326_v52, %v326_v52  ;;  %v406_v16 = vsel %vm387_vm1, %v1212_v2, -inf }
  0xc4   :  { %v141_v39 = vpop.permute.xlu1 %140  ;;  %v1224_v17 = vadd.f32 %v354_v40, %v275_v63 }
  0xc5   :  { %v274_v45 = vmul.f32 %v244_v34, %v141_v39  ;;  %398 = vmax.xlane.f32.xlu0 %v397_v46  ;;  %v159_v0 = vpop.permute.xlu0 %158  ;;  %v409_v5 = vsel %vm387_vm1, %v1208_v59, -inf  ;;  %v362_v24 = vrot.slane %v330_v11, %v1138_v14 }
  0xc6   :  { %v277_v18 = vmul.f32 %v252_v60, %v159_v0  ;;  %v418_v25 = vsel %vm387_vm1, %v1224_v17, -inf }
  0xc7   :  { %v1198_v50 = vadd.f32 %v350_v42, %v274_v45 }
  0xc8   :  { %v152_v54 = vpop.permute.xlu1 %151  ;;  %v1235_v29 = vadd.f32 %v358_v9, %v277_v18 }
  0xc9   :  { %v276_v56 = vmul.f32 %v248_v49, %v152_v54  ;;  %v415_v57 = vsel %vm387_vm1, %v1198_v50, -inf  ;;  %401 = vmax.xlane.f32.xlu0 %v400_v55  ;;  %v170_v23 = vpop.permute.xlu0 %169 }
  0xca   :  { %416 = vmax.xlane.f32.xlu1 %v415_v57  ;;  %v279_v27 = vmul.f32 %v256_v8, %v170_v23  ;;  %v424_v31 = vsel %vm387_vm1, %v1235_v29, -inf }
  0xcb   :  { %v1218_v6 = vadd.f32 %v354_v40, %v276_v56 }
  0xcc   :  { %v163_v1 = vpop.permute.xlu1 %162  ;;  %v1243_v14 = vadd.f32 %v362_v24, %v279_v27 }
  0xcd   :  { %v278_v3 = vmul.f32 %v252_v60, %v163_v1  ;;  %413 = vmax.xlane.f32.xlu0 %v412_v4  ;;  %v421_v20 = vsel %vm387_vm1, %v1218_v6, -inf }
  0xce   :  { %410 = vmax.xlane.f32.xlu1 %v409_v5  ;;  %v430_v34 = vsel %vm387_vm1, %v1243_v14, -inf }
  0xcf   :  { %v1228_v21 = vadd.f32 %v358_v9, %v278_v3 }
  0xd0   :  { %v174_v15 = vpop.permute.xlu1 %173 }
  0xd1   :  { %v280_v19 = vmul.f32 %v256_v8, %v174_v15  ;;  %407 = vmax.xlane.f32.xlu0 %v406_v16  ;;  %v427_v28 = vsel %vm387_vm1, %v1228_v21, -inf }
  0xd2   :  { %422 = vmax.xlane.f32.xlu1 %v421_v20 }
  0xd3   :  { %v1237_v30 = vadd.f32 %v362_v24, %v280_v19 }
  0xd5   :  { %419 = vmax.xlane.f32.xlu0 %v418_v25  ;;  %v433_v32 = vsel %vm387_vm1, %v1237_v30, -inf }
  0xd6   :  { %428 = vmax.xlane.f32.xlu1 %v427_v28 }
  0xd9   :  { %425 = vmax.xlane.f32.xlu0 %v424_v31 }
  0xda   :  { %434 = vmax.xlane.f32.xlu1 %v433_v32 }
  0xdd   :  { %431 = vmax.xlane.f32.xlu0 %v430_v34 }
 0x146   :  { %v393_v35 = vpop.xlane.xlu1 %392  ;;  %v390_v37 = vpop.xlane.xlu0 %389 }
 0x147   :  { %v437_v36 = vsub.f32 %v1164_v7, %v393_v35  ;;  %v436_v38 = vsub.f32 %v1168_v10, %v390_v37 }
 0x149   :  { %v454_v39 = vmul.f32 1.442695, %v437_v36  ;;  %v452_v42 = vmul.f32 1.442695, %v436_v38 }
 0x14a   :  { %v396_v43 = vpop.xlane.xlu0 %395 }
 0x14b   :  { %953 = vpow2.f32 %v454_v39  ;;  %v405_v44 = vpop.xlane.xlu1 %404  ;;  %v438_v45 = vsub.f32 %v1177_v22, %v396_v43 }
 0x14c   :  { %955 = vpow2.f32 %v452_v42  ;;  %v441_v46 = vsub.f32 %v1180_v26, %v405_v44 }
 0x14d   :  { %v456_v47 = vmul.f32 1.442695, %v438_v45 }
 0x14e   :  { %v399_v48 = vpop.xlane.xlu0 %398  ;;  %v462_v51 = vmul.f32 1.442695, %v441_v46 }
 0x14f   :  { %957 = vpow2.f32 %v456_v47  ;;  %v439_v49 = vsub.f32 %v1187_v33, %v399_v48 }
 0x151   :  { %v458_v7 = vmul.f32 1.442695, %v439_v49 }
 0x152   :  { %v402_v52 = vpop.xlane.xlu0 %401 }
 0x153   :  { %v417_v53 = vpop.xlane.xlu1 %416  ;;  %959 = vpow2.f32 %v458_v7  ;;  %v440_v10 = vsub.f32 %v1192_v41, %v402_v52 }
 0x154   :  { %v445_v54 = vsub.f32 %v1198_v50, %v417_v53  ;;  %961 = vpow2.f32 %v462_v51 }
 0x155   :  { %v460_v55 = vmul.f32 1.442695, %v440_v10 }
 0x156   :  { %v470_v56 = vmul.f32 1.442695, %v445_v54  ;;  %v414_v22 = vpop.xlane.xlu0 %413  ;;  %v1280_v54 = vand.u32 127, %v67_v12 }
 0x157   :  { %v411_v57 = vpop.xlane.xlu1 %410  ;;  %963 = vpow2.f32 %v460_v55  ;;  %v444_v60 = vsub.f32 %v1206_v58, %v414_v22 }
 0x158   :  { %v954_v26 = vpop.eup %953  ;;  %v443_v33 = vsub.f32 %v1208_v59, %v411_v57  ;;  %965 = vpow2.f32 %v470_v56  ;;  %v598_v55 = vsub.s32 15, %v1280_v54  ;;  %v1087_v56 = vmov 0  }
 0x159   :  { %v956_v61 = vpop.eup %955  ;;  %v487_v40 = vsel %vm387_vm1, %v954_v26, 0.0  ;;  %v468_v62 = vmul.f32 1.442695, %v444_v60  ;;  %952 = vset.pattern.permute.xlu0 %v1087_v56  ;;  %951 = vset.pattern.permute.xlu1 %v1087_v56 }
 0x15a   :  { %v466_v63 = vmul.f32 1.442695, %v443_v33  ;;  %488 = vadd.xlane.f32.xlu1 %v487_v40  ;;  %v484_v41 = vsel %vm387_vm1, %v956_v61, 0.0  ;;  %v408_v50 = vpop.xlane.xlu0 %407 }
 0x15b   :  { %485 = vadd.xlane.f32.xlu0 %v484_v41  ;;  %v423_v0 = vpop.xlane.xlu1 %422  ;;  %967 = vpow2.f32 %v468_v62  ;;  %v442_v1 = vsub.f32 %v1212_v2, %v408_v50 }
 0x15c   :  { %v447_v3 = vsub.f32 %v1218_v6, %v423_v0  ;;  %v958_v58 = vpop.eup %957  ;;  %969 = vpow2.f32 %v466_v63 }
 0x15d   :  { %v464_v59 = vmul.f32 1.442695, %v442_v1  ;;  %v490_v5 = vsel %vm387_vm1, %v958_v58, 0.0 }
 0x15e   :  { %v474_v4 = vmul.f32 1.442695, %v447_v3  ;;  %v420_v8 = vpop.xlane.xlu0 %419 }
 0x15f   :  { %491 = vadd.xlane.f32.xlu0 %v490_v5  ;;  %v429_v9 = vpop.xlane.xlu1 %428  ;;  %971 = vpow2.f32 %v464_v59  ;;  %v446_v11 = vsub.f32 %v1224_v17, %v420_v8 }
 0x160   :  { %v449_v15 = vsub.f32 %v1228_v21, %v429_v9  ;;  %v960_v16 = vpop.eup %959  ;;  %973 = vpow2.f32 %v474_v4 }
 0x161   :  { %v962_v18 = vpop.eup %961  ;;  %v472_v2 = vmul.f32 1.442695, %v446_v11  ;;  %v493_v6 = vsel %vm387_vm1, %v960_v16, 0.0 }
 0x162   :  { %v478_v19 = vmul.f32 1.442695, %v449_v15  ;;  %494 = vadd.xlane.f32.xlu1 %v493_v6  ;;  %v426_v20 = vpop.xlane.xlu0 %425  ;;  %v499_v17 = vsel %vm387_vm1, %v962_v18, 0.0 }
 0x163   :  { %v435_v23 = vpop.xlane.xlu1 %434  ;;  %975 = vpow2.f32 %v472_v2  ;;  %v448_v24 = vsub.f32 %v1235_v29, %v426_v20 }
 0x164   :  { %v451_v25 = vsub.f32 %v1237_v30, %v435_v23  ;;  %v964_v27 = vpop.eup %963  ;;  %977 = vpow2.f32 %v478_v19 }
 0x165   :  { %v476_v21 = vmul.f32 1.442695, %v448_v24  ;;  %v496_v31 = vsel %vm387_vm1, %v964_v27, 0.0  ;;  %v966_v32 = vpop.eup %965 }
 0x166   :  { %v482_v28 = vmul.f32 1.442695, %v451_v25  ;;  %500 = vadd.xlane.f32.xlu1 %v499_v17  ;;  %497 = vadd.xlane.f32.xlu0 %v496_v31  ;;  %v432_v34 = vpop.xlane.xlu0 %431  ;;  %v511_v30 = vsel %vm387_vm1, %v966_v32, 0.0 }
 0x167   :  { %979 = vpow2.f32 %v476_v21  ;;  %v450_v35 = vsub.f32 %v1243_v14, %v432_v34 }
 0x168   :  { %v968_v36 = vpop.eup %967  ;;  %981 = vpow2.f32 %v482_v28 }
 0x169   :  { %v480_v29 = vmul.f32 1.442695, %v450_v35  ;;  %v508_v37 = vsel %vm387_vm1, %v968_v36, 0.0  ;;  %v970_v38 = vpop.eup %969 }
 0x16a   :  { %512 = vadd.xlane.f32.xlu1 %v511_v30  ;;  %509 = vadd.xlane.f32.xlu0 %v508_v37  ;;  %v505_v42 = vsel %vm387_vm1, %v970_v38, 0.0 }
 0x16b   :  { %983 = vpow2.f32 %v480_v29 }
 0x16c   :  { %v972_v39 = vpop.eup %971 }
 0x16d   :  { %v502_v43 = vsel %vm387_vm1, %v972_v39, 0.0  ;;  %v974_v44 = vpop.eup %973 }
 0x16e   :  { %506 = vadd.xlane.f32.xlu1 %v505_v42  ;;  %503 = vadd.xlane.f32.xlu0 %v502_v43  ;;  %v517_v45 = vsel %vm387_vm1, %v974_v44, 0.0 }
 0x170   :  { %v976_v14 = vpop.eup %975 }
 0x171   :  { %v514_v46 = vsel %vm387_vm1, %v976_v14, 0.0  ;;  %v978_v47 = vpop.eup %977 }
 0x172   :  { %518 = vadd.xlane.f32.xlu1 %v517_v45  ;;  %515 = vadd.xlane.f32.xlu0 %v514_v46  ;;  %v523_v49 = vsel %vm387_vm1, %v978_v47, 0.0 }
 0x174   :  { %v980_v48 = vpop.eup %979 }
 0x175   :  { %v520_v51 = vsel %vm387_vm1, %v980_v48, 0.0  ;;  %v982_v7 = vpop.eup %981 }
 0x176   :  { %524 = vadd.xlane.f32.xlu1 %v523_v49  ;;  %521 = vadd.xlane.f32.xlu0 %v520_v51  ;;  %v529_v53 = vsel %vm387_vm1, %v982_v7, 0.0 }
 0x178   :  { %v984_v52 = vpop.eup %983 }
 0x179   :  { %v526_v10 = vsel %vm387_vm1, %v984_v52, 0.0 }
 0x17a   :  { %530 = vadd.xlane.f32.xlu1 %v529_v53  ;;  %527 = vadd.xlane.f32.xlu0 %v526_v10 }
 0x18b   :  { %604 = vbcast.lane.b32.xlu1 %v598_v55, 264 }
 0x190   :  { %600 = vbcast.lane.b32.xlu0 %v598_v55, 256 }
 0x1e3   :  { %v489_v57 = vpop.xlane.xlu1 %488 }
 0x1e4   :  { %v486_v22 = vpop.xlane.xlu0 %485 }
 0x1e5   :  { %985 = vrcp.f32 %v486_v22 }
 0x1e8   :  { %v492_v26 = vpop.xlane.xlu0 %491 }
 0x1e9   :  { %987 = vrcp.f32 %v492_v26 }
 0x1ea   :  { %989 = vrcp.f32 %v489_v57 }
 0x1eb   :  { %v495_v60 = vpop.xlane.xlu1 %494 }
 0x1ef   :  { %v501_v33 = vpop.xlane.xlu1 %500  ;;  %v498_v61 = vpop.xlane.xlu0 %497 }
 0x1f0   :  { %991 = vrcp.f32 %v501_v33 }
 0x1f1   :  { %993 = vrcp.f32 %v495_v60 }
 0x1f2   :  { %v986_v0 = vpop.eup %985 }
 0x1f3   :  { %v513_v40 = vpop.xlane.xlu1 %512  ;;  %v1283_v62 = vpop.xlane.xlu0 %509  ;;  %v548_v4 = vmul.f32 %v986_v0, %v486_v22 }
 0x1f4   :  { %995 = vrcp.f32 %v513_v40 }
 0x1f5   :  { %v582_v18 = vand.u32 4294967280, %v548_v4 }
 0x1f6   :  { %v988_v1 = vpop.eup %987 }
 0x1f7   :  { %v507_v12 = vpop.xlane.xlu1 %506  ;;  %v1285_v63 = vpop.xlane.xlu0 %503  ;;  %v550_v5 = vmul.f32 %v988_v1, %v492_v26 }
 0x1f8   :  { %997 = vrcp.f32 %v507_v12  ;;  %v990_v59 = vpop.eup %989 }
 0x1f9   :  { %999 = vrcp.f32 %v498_v61  ;;  %v549_v16 = vmul.f32 %v990_v59, %v489_v57  ;;  %v584_v2 = vand.u32 4294967280, %v550_v5 }
 0x1fb   :  { %v519_v41 = vpop.xlane.xlu1 %518  ;;  %v1287_v50 = vpop.xlane.xlu0 %515  ;;  %v583_v17 = vand.u32 4294967280, %v549_v16 }
 0x1fc   :  { %1001 = vrcp.f32 %v519_v41 }
 0x1fd   :  { %1003 = vrcp.f32 %v1283_v62  ;;  %v992_v8 = vpop.eup %991 }
 0x1fe   :  { %1005 = vrcp.f32 %v1285_v63  ;;  %v994_v15 = vpop.eup %993  ;;  %v553_v19 = vmul.f32 %v992_v8, %v501_v33 }
 0x1ff   :  { %v525_v3 = vpop.xlane.xlu1 %524  ;;  %v1289_v58 = vpop.xlane.xlu0 %521  ;;  %v551_v21 = vmul.f32 %v994_v15, %v495_v60 }
 0x200   :  { %1007 = vrcp.f32 %v525_v3  ;;  %v587_v28 = vand.u32 4294967280, %v553_v19 }
 0x201   :  { %v996_v6 = vpop.eup %995  ;;  %1009 = vrcp.f32 %v1287_v50  ;;  %v585_v30 = vand.u32 4294967280, %v551_v21 }
 0x202   :  { %v557_v31 = vmul.f32 %v996_v6, %v513_v40 }
 0x203   :  { %v531_v9 = vpop.xlane.xlu1 %530  ;;  %v1293_v11 = vpop.xlane.xlu0 %527 }
 0x204   :  { %1011 = vrcp.f32 %v531_v9  ;;  %v591_v38 = vand.u32 4294967280, %v557_v31 }
 0x205   :  { %v998_v25 = vpop.eup %997  ;;  %1013 = vrcp.f32 %v1289_v58 }
 0x206   :  { %v1000_v32 = vpop.eup %999  ;;  %v555_v34 = vmul.f32 %v998_v25, %v507_v12  ;;  %1015 = vrcp.f32 %v1293_v11 }
 0x207   :  { %v1296_v20 = vpop.permute.xlu0 %600  ;;  %v605_v27 = vpop.permute.xlu1 %604  ;;  %v552_v37 = vmul.f32 %v1000_v32, %v498_v61 }
 0x208   :  { %v608_v23 = vor.u32 %v1296_v20, %v584_v2  ;;  %v606_v24 = vor.u32 %v1296_v20, %v582_v18  ;;  %v611_v35 = vor.u32 %v605_v27, %v587_v28  ;;  %v607_v36 = vor.u32 %v605_v27, %v583_v17 }
 0x209   :  { %v1002_v29 = vpop.eup %1001  ;;  %v589_v43 = vand.u32 4294967280, %v555_v34  ;;  %v615_v14 = vor.u32 %v605_v27, %v591_v38  ;;  %v609_v45 = vor.u32 %v605_v27, %v585_v30  ;;  %v586_v47 = vand.u32 4294967280, %v552_v37 }
 0x20a   :  { %629 = vperm.xlu0 %952, %v608_v23   ;;  %623 = vperm.xlu1 %951, %v606_v24   ;;  %v1004_v39 = vpop.eup %1003  ;;  %v559_v44 = vmul.f32 %v1002_v29, %v519_v41  ;;  %v674_v23 = vadd.s32 4294967288, %v1280_v54 }
 0x20b   :  { %v1006_v42 = vpop.eup %1005  ;;  %v556_v48 = vmul.f32 %v1004_v39, %v1283_v62  ;;  %v613_v53 = vor.u32 %v605_v27, %v589_v43  ;;  %v610_v10 = vor.u32 %v1296_v20, %v586_v47 }
 0x20c   :  { %v554_v49 = vmul.f32 %v1006_v42, %v1285_v63  ;;  %v593_v7 = vand.u32 4294967280, %v559_v44  ;;  %v677_v17 = vsub.s32 %v674_v23, %v1135_v13 }
 0x20d   :  { %v1008_v46 = vpop.eup %1007  ;;  %v590_v56 = vand.u32 4294967280, %v556_v48 }
 0x20e   :  { %638 = vperm.xlu0 %952, %v611_v35   ;;  %626 = vperm.xlu1 %951, %v607_v36   ;;  %v1010_v51 = vpop.eup %1009  ;;  %v561_v52 = vmul.f32 %v1008_v46, %v525_v3  ;;  %v588_v22 = vand.u32 4294967280, %v554_v49  ;;  %v617_v33 = vor.u32 %v605_v27, %v593_v7 }
 0x20f   :  { %v558_v57 = vmul.f32 %v1010_v51, %v1287_v50  ;;  %v614_v61 = vor.u32 %v1296_v20, %v590_v56 }
 0x210   :  { %v595_v26 = vand.u32 4294967280, %v561_v52  ;;  %v612_v62 = vor.u32 %v1296_v20, %v588_v22 }
 0x211   :  { %v1012_v55 = vpop.eup %1011  ;;  %v592_v63 = vand.u32 4294967280, %v558_v57 }
 0x212   :  { %650 = vperm.xlu0 %952, %v615_v14   ;;  %632 = vperm.xlu1 %951, %v609_v45   ;;  %v563_v60 = vmul.f32 %v1012_v55, %v531_v9  ;;  %v1014_v40 = vpop.eup %1013  ;;  %v619_v1 = vor.u32 %v605_v27, %v595_v26 }
 0x213   :  { %v1016_v12 = vpop.eup %1015  ;;  %v560_v41 = vmul.f32 %v1014_v40, %v1289_v58  ;;  %v616_v4 = vor.u32 %v1296_v20, %v592_v63 }
 0x214   :  { %v597_v0 = vand.u32 4294967280, %v563_v60  ;;  %v562_v50 = vmul.f32 %v1016_v12, %v1293_v11 }
 0x215   :  { %v594_v3 = vand.u32 4294967280, %v560_v41 }
 0x216   :  { %644 = vperm.xlu0 %952, %v613_v53   ;;  %635 = vperm.xlu1 %951, %v610_v10   ;;  %v621_v59 = vor.u32 %v605_v27, %v597_v0  ;;  %v596_v5 = vand.u32 4294967280, %v562_v50  ;;  %v672_v27 = vsub.s32 %v1280_v54, %v1135_v13 }
 0x217   :  { %v618_v8 = vor.u32 %v1296_v20, %v594_v3 }
 0x218   :  { %v620_v9 = vor.u32 %v1296_v20, %v596_v5 }
 0x21a   :  { %656 = vperm.xlu0 %952, %v617_v33   ;;  %647 = vperm.xlu1 %951, %v614_v61  }
 0x21e   :  { %662 = vperm.xlu0 %952, %v619_v1   ;;  %641 = vperm.xlu1 %951, %v612_v62  }
 0x222   :  { %668 = vperm.xlu0 %952, %v621_v59   ;;  %653 = vperm.xlu1 %951, %v616_v4  }
 0x226   :  { %659 = vperm.xlu1 %951, %v618_v8  }
 0x22a   :  { %665 = vperm.xlu1 %951, %v620_v9  }
 0x285   :  { %v630_v58 = vpop.permute.xlu0 %629  ;;  %v624_v15 = vpop.permute.xlu1 %623 }
 0x286   :  { %v684_v31 = vrot.slane %v630_v58, %v672_v27  ;;  %v673_v30 = vrot.slane %v624_v15, %v672_v27 }
 0x289   :  { %v639_v16 = vpop.permute.xlu0 %638  ;;  %v627_v18 = vpop.permute.xlu1 %626 }
 0x28a   :  { %v678_v32 = vrot.slane %v627_v18, %v677_v17  ;;  %v697_v35 = vrot.slane %v639_v16, %v677_v17 }
 0x28c   :  { %v680_v13 = vsel %vm679_vm2, %v678_v32, %v673_v30 }
 0x28d   :  { %v651_v2 = vpop.permute.xlu0 %650  ;;  %v633_v19 = vpop.permute.xlu1 %632 }
 0x28e   :  { %v688_v20 = vrot.slane %v633_v19, %v677_v17  ;;  %v715_v49 = vrot.slane %v651_v2, %v677_v17 }
 0x290   :  { %v689_v37 = vsel %vm679_vm2, %v688_v20, %v684_v31 }
 0x291   :  { %v645_v6 = vpop.permute.xlu0 %644  ;;  %v636_v11 = vpop.permute.xlu1 %635  ;;  %v745_v44 = vsel %vm744_vm3, %v689_v37, %v680_v13 }
 0x292   :  { %v693_v28 = vrot.slane %v636_v11, %v672_v27  ;;  %v706_v38 = vrot.slane %v645_v6, %v677_v17 }
 0x294   :  { %v698_v39 = vsel %vm679_vm2, %v697_v35, %v693_v28 }
 0x295   :  { %v648_v24 = vpop.permute.xlu1 %647  ;;  %v657_v25 = vpop.permute.xlu0 %656  ;;  %v747_v46 = vsel %vm746_vm4, %v698_v39, %v745_v44  ;;  %vm770_vm4 = vcmp.eq.s32.totalorder %v1280_v54, 0 }
 0x296   :  { %v711_v14 = vrot.slane %v648_v24, %v672_v27  ;;  %v724_v47 = vrot.slane %v657_v25, %v677_v17 }
 0x298   :  { %v716_v10 = vsel %vm679_vm2, %v715_v49, %v711_v14 }
 0x299   :  { %v642_v21 = vpop.permute.xlu1 %641  ;;  %v663_v36 = vpop.permute.xlu0 %662 }
 0x29a   :  { %v702_v34 = vrot.slane %v642_v21, %v672_v27  ;;  %v733_v51 = vrot.slane %v663_v36, %v677_v17 }
 0x29c   :  { %v707_v42 = vsel %vm679_vm2, %v706_v38, %v702_v34 }
 0x29d   :  { %v654_v29 = vpop.permute.xlu1 %653  ;;  %v749_v7 = vsel %vm748_vm5, %v707_v42, %v747_v46  ;;  %v669_v52 = vpop.permute.xlu0 %668  ;;  %vm772_vm5 = vcmp.eq.s32.totalorder %v1280_v54, 10 }
 0x29e   :  { %v720_v43 = vrot.slane %v654_v29, %v672_v27  ;;  %v742_v22 = vrot.slane %v669_v52, %v677_v17  ;;  %v751_v26 = vsel %vm750_vm6, %v716_v10, %v749_v7  ;;  %vm787_vm6 = vcmp.eq.s32.totalorder %v1280_v54, 1 }
 0x2a0   :  { %v725_v53 = vsel %vm679_vm2, %v724_v47, %v720_v43  ;;  %v1017_v43 = vld [vmem:[#allocation5] sm:$0xff] }
 0x2a1   :  { %v660_v45 = vpop.permute.xlu1 %659  ;;  %v753_v60 = vsel %vm752_vm7, %v725_v53, %v751_v26  ;;  %vm789_vm7 = vcmp.eq.s32.totalorder %v1280_v54, 11 }
 0x2a2   :  { %v729_v48 = vrot.slane %v660_v45, %v672_v27 }
 0x2a4   :  { %v734_v55 = vsel %vm679_vm2, %v733_v51, %v729_v48 }
 0x2a5   :  { %v666_v56 = vpop.permute.xlu1 %665  ;;  %v755_v61 = vsel %vm754_vm8, %v734_v55, %v753_v60  ;;  %vm804_vm8 = vcmp.eq.s32.totalorder %v1280_v54, 2 }
 0x2a6   :  { %v738_v57 = vrot.slane %v666_v56, %v672_v27 }
 0x2a8   :  { %v743_v33 = vsel %vm679_vm2, %v742_v22, %v738_v57 }
 0x2a9   :  { %v757_v40 = vsel %vm756_vm9, %v743_v33, %v755_v61 }
 0x2aa   :  { %v759_v62 = vsel %vm387_vm1, %v757_v40, -inf }
 0x2ab   :  { %760 = vmax.xlane.f32.xlu1 %v759_v62 }
 0x334   :  { %v761_v12 = vpop.xlane.xlu1 %760 }
 0x335   :  { %v763_v63 = vand.u32 15, %v761_v12 }
 0x337   :  { %v1326_v41 = vsub.s32 15, %v763_v63 }
 0x339   :  { %vm765_vm10 = vcmp.eq.s32.totalorder %v1280_v54, %v1326_v41 }
 0x33a   :  { %v775_v0 = vsel %vm765_vm10, -inf, %v757_v40  ;;  %v766_v44 = vsel %vm765_vm10, %v1017_v43, 0.0  ;;  %vm806_vm10 = vcmp.eq.s32.totalorder %v1280_v54, 12 }
 0x33b   :  { %v776_v1 = vsel %vm387_vm1, %v775_v0, -inf  ;;  %v767_v14 = vsel %vm387_vm1, %v766_v44, 0.0 }
 0x33c   :  { %777 = vmax.xlane.f32.xlu0 %v776_v1 }
 0x3c5   :  { %v778_v3 = vpop.xlane.xlu0 %777 }
 0x3c6   :  { %v780_v50 = vand.u32 15, %v778_v3 }
 0x3c8   :  { %v1334_v59 = vsub.s32 15, %v780_v50  ;;  %v773_v50 = vcvt.s32.f32 %v1326_v41 }
 0x3ca   :  { %vm782_vm11 = vcmp.eq.s32.totalorder %v1280_v54, %v1334_v59 }
 0x3cb   :  { %v792_v4 = vsel %vm782_vm11, -inf, %v775_v0  ;;  %v783_v57 = vsel %vm782_vm11, %v1017_v43, 0.0  ;;  %vm821_vm11 = vcmp.eq.s32.totalorder %v1280_v54, 3 }
 0x3cc   :  { %v793_v5 = vsel %vm387_vm1, %v792_v4, -inf  ;;  %v784_v26 = vsel %vm387_vm1, %v783_v57, 0.0 }
 0x3cd   :  { %794 = vmax.xlane.f32.xlu0 %v793_v5 }
 0x456   :  { %v795_v8 = vpop.xlane.xlu0 %794 }
 0x457   :  { %v797_v9 = vand.u32 15, %v795_v8  ;;  %v790_v8 = vcvt.s32.f32 %v1334_v59 }
 0x459   :  { %v1342_v58 = vsub.s32 15, %v797_v9 }
 0x45b   :  { %vm799_vm12 = vcmp.eq.s32.totalorder %v1280_v54, %v1342_v58  ;;  %v807_v41 = vcvt.s32.f32 %v1342_v58 }
 0x45c   :  { %v809_v15 = vsel %vm799_vm12, -inf, %v792_v4  ;;  %v800_v45 = vsel %vm799_vm12, %v1017_v43, 0.0  ;;  %vm823_vm12 = vcmp.eq.s32.totalorder %v1280_v54, 13 }
 0x45d   :  { %v810_v16 = vsel %vm387_vm1, %v809_v15, -inf  ;;  %v801_v46 = vsel %vm387_vm1, %v800_v45, 0.0 }
 0x45e   :  { %811 = vmax.xlane.f32.xlu0 %v810_v16 }
 0x4e7   :  { %v812_v18 = vpop.xlane.xlu0 %811 }
 0x4e8   :  { %v814_v2 = vand.u32 15, %v812_v18 }
 0x4ea   :  { %v1350_v19 = vsub.s32 15, %v814_v2 }
 0x4ec   :  { %vm816_vm13 = vcmp.eq.s32.totalorder %v1280_v54, %v1350_v19 }
 0x4ed   :  { %v826_v6 = vsel %vm816_vm13, -inf, %v809_v15  ;;  %v817_v60 = vsel %vm816_vm13, %v1017_v43, 0.0  ;;  %vm838_vm13 = vcmp.eq.s32.totalorder %v1280_v54, 4 }
 0x4ee   :  { %v827_v11 = vsel %vm387_vm1, %v826_v6, -inf  ;;  %v818_v33 = vsel %vm387_vm1, %v817_v60, 0.0 }
 0x4ef   :  { %828 = vmax.xlane.f32.xlu1 %v827_v11  ;;  %v824_v11 = vcvt.s32.f32 %v1350_v19 }
 0x578   :  { %v829_v23 = vpop.xlane.xlu1 %828 }
 0x579   :  { %v831_v24 = vand.u32 15, %v829_v23 }
 0x57b   :  { %v1358_v25 = vsub.s32 15, %v831_v24 }
 0x57d   :  { %vm833_vm14 = vcmp.eq.s32.totalorder %v1280_v54, %v1358_v25  ;;  %v841_v58 = vcvt.s32.f32 %v1358_v25 }
 0x57e   :  { %v843_v27 = vsel %vm833_vm14, -inf, %v826_v6  ;;  %v834_v47 = vsel %vm833_vm14, %v1017_v43, 0.0  ;;  %vm840_vm14 = vcmp.eq.s32.totalorder %v1280_v54, 14 }
 0x57f   :  { %v844_v17 = vsel %vm387_vm1, %v843_v27, -inf  ;;  %v835_v48 = vsel %vm387_vm1, %v834_v47, 0.0 }
 0x580   :  { %845 = vmax.xlane.f32.xlu0 %v844_v17 }
 0x609   :  { %v846_v21 = vpop.xlane.xlu0 %845 }
 0x60a   :  { %v848_v20 = vand.u32 15, %v846_v21 }
 0x60c   :  { %v1366_v28 = vsub.s32 15, %v848_v20 }
 0x60e   :  { %vm850_vm15 = vcmp.eq.s32.totalorder %v1280_v54, %v1366_v28 }
 0x60f   :  { %v860_v31 = vsel %vm850_vm15, -inf, %v843_v27  ;;  %v851_v61 = vsel %vm850_vm15, %v1017_v43, 0.0  ;;  %vm855_vm15 = vcmp.eq.s32.totalorder %v1280_v54, 5 }
 0x610   :  { %v861_v32 = vsel %vm387_vm1, %v860_v31, -inf  ;;  %v852_v40 = vsel %vm387_vm1, %v851_v61, 0.0 }
 0x611   :  { %862 = vmax.xlane.f32.xlu1 %v861_v32 }
 0x69a   :  { %v863_v34 = vpop.xlane.xlu1 %862 }
 0x69b   :  { %v865_v35 = vand.u32 15, %v863_v34 }
 0x69d   :  { %v1374_v36 = vsub.s32 15, %v865_v35 }
 0x69f   :  { %vm867_vm0 = vcmp.eq.s32.totalorder %v1280_v54, %v1374_v36  ;;  %v875_v35 = vcvt.s32.f32 %v1374_v36 }
 0x6a0   :  { %v877_v29 = vsel %vm867_vm0, -inf, %v860_v31  ;;  %v868_v49 = vsel %vm867_vm0, %v1017_v43, 0.0  ;;  %v858_v31 = vcvt.s32.f32 %v1366_v28  ;;  %vm872_vm0 = vcmp.eq.s32.totalorder %v1280_v54, 6 }
 0x6a1   :  { %v878_v30 = vsel %vm387_vm1, %v877_v29, -inf  ;;  %v869_v51 = vsel %vm387_vm1, %v868_v49, 0.0 }
 0x6a2   :  { %879 = vmax.xlane.f32.xlu0 %v878_v30 }
 0x72b   :  { %v880_v37 = vpop.xlane.xlu0 %879 }
 0x72c   :  { %v882_v38 = vand.u32 15, %v880_v37 }
 0x72e   :  { %v1382_v39 = vsub.s32 15, %v882_v38 }
 0x730   :  { %vm884_vm2 = vcmp.eq.s32.totalorder %v1280_v54, %v1382_v39  ;;  %v892_v37 = vcvt.s32.f32 %v1382_v39 }
 0x731   :  { %v894_v13 = vsel %vm884_vm2, -inf, %v877_v29  ;;  %v885_v62 = vsel %vm884_vm2, %v1017_v43, 0.0  ;;  %vm874_vm2 = vcmp.eq.s32.totalorder %v1280_v54, 16 }
 0x732   :  { %v895_v42 = vsel %vm387_vm1, %v894_v13, -inf  ;;  %v886_v12 = vsel %vm387_vm1, %v885_v62, 0.0 }
 0x733   :  { %896 = vmax.xlane.f32.xlu1 %v895_v42 }
 0x737   :  { %768 = vadd.xlane.f32.xlu1 %v767_v14 }
 0x73b   :  { %802 = vadd.xlane.f32.xlu1 %v801_v46 }
 0x73f   :  { %836 = vadd.xlane.f32.xlu1 %v835_v48 }
 0x743   :  { %870 = vadd.xlane.f32.xlu1 %v869_v51 }
 0x7bc   :  { %v897_v7 = vpop.xlane.xlu1 %896 }
 0x7bd   :  { %v899_v52 = vand.u32 15, %v897_v7 }
 0x7bf   :  { %v1406_v53 = vsub.s32 15, %v899_v52 }
 0x7c0   :  { %v769_v63 = vpop.xlane.xlu1 %768 }
 0x7c1   :  { %vm901_vm3 = vcmp.eq.s32.totalorder %v1280_v54, %v1406_v53  ;;  %v771_v1 = vsel %vm770_vm4, %v769_v63, 0.0  ;;  %vm891_vm4 = vcmp.eq.s32.totalorder %v1280_v54, 17  ;;  %v909_v42 = vcvt.s32.f32 %v1406_v53 }
 0x7c2   :  { %v911_v10 = vsel %vm901_vm3, -inf, %v894_v13  ;;  %v902_v55 = vsel %vm901_vm3, %v1017_v43, 0.0  ;;  %v774_v9 = vsel %vm772_vm5, %v773_v50, %v771_v1  ;;  %vm889_vm3 = vcmp.eq.s32.totalorder %v1280_v54, 7 }
 0x7c3   :  { %v912_v56 = vsel %vm387_vm1, %v911_v10, -inf  ;;  %v903_v22 = vsel %vm387_vm1, %v902_v55, 0.0  ;;  %vm906_vm5 = vcmp.eq.s32.totalorder %v1280_v54, 8 }
 0x7c4   :  { %913 = vmax.xlane.f32.xlu0 %v912_v56  ;;  %904 = vadd.xlane.f32.xlu1 %v903_v22  ;;  %v803_v4 = vpop.xlane.xlu1 %802 }
 0x7c8   :  { %785 = vadd.xlane.f32.xlu0 %v784_v26  ;;  %v837_v23 = vpop.xlane.xlu1 %836 }
 0x7cc   :  { %819 = vadd.xlane.f32.xlu0 %v818_v33  ;;  %v871_v29 = vpop.xlane.xlu1 %870 }
 0x7d0   :  { %853 = vadd.xlane.f32.xlu0 %v852_v40 }
 0x7d4   :  { %887 = vadd.xlane.f32.xlu0 %v886_v12 }
 0x84d   :  { %v914_v0 = vpop.xlane.xlu0 %913 }
 0x84e   :  { %v916_v3 = vand.u32 15, %v914_v0 }
 0x850   :  { %v1432_v5 = vsub.s32 15, %v916_v3 }
 0x851   :  { %v786_v15 = vpop.xlane.xlu0 %785 }
 0x852   :  { %v788_v16 = vsel %vm787_vm6, %v786_v15, %v774_v9  ;;  %vm918_vm9 = vcmp.eq.s32.totalorder %v1280_v54, %v1432_v5  ;;  %vm908_vm6 = vcmp.eq.s32.totalorder %v1280_v54, 18  ;;  %v926_v39 = vcvt.s32.f32 %v1432_v5 }
 0x853   :  { %v791_v18 = vsel %vm789_vm7, %v790_v8, %v788_v16  ;;  %v919_v2 = vsel %vm918_vm9, %v1017_v43, 0.0  ;;  %v905_v43 = vpop.xlane.xlu1 %904  ;;  %vm923_vm7 = vcmp.eq.s32.totalorder %v1280_v54, 9  ;;  %vm928_vm9 = vcmask 162816  }
 0x854   :  { %v920_v6 = vsel %vm387_vm1, %v919_v2, 0.0  ;;  %v805_v59 = vsel %vm804_vm8, %v803_v4, %v791_v18  ;;  %vm857_vm1 = vcmp.eq.s32.totalorder %v1280_v54, 15  ;;  %vm925_vm8 = vcmp.eq.s32.totalorder %v1280_v54, 19 }
 0x855   :  { %921 = vadd.xlane.f32.xlu0 %v920_v6  ;;  %v820_v24 = vpop.xlane.xlu0 %819  ;;  %v808_v27 = vsel %vm806_vm10, %v807_v41, %v805_v59 }
 0x856   :  { %v822_v17 = vsel %vm821_vm11, %v820_v24, %v808_v27 }
 0x857   :  { %v825_v21 = vsel %vm823_vm12, %v824_v11, %v822_v17 }
 0x858   :  { %v839_v20 = vsel %vm838_vm13, %v837_v23, %v825_v21 }
 0x859   :  { %v854_v19 = vpop.xlane.xlu0 %853  ;;  %v842_v32 = vsel %vm840_vm14, %v841_v58, %v839_v20 }
 0x85a   :  { %v856_v34 = vsel %vm855_vm15, %v854_v19, %v842_v32 }
 0x85b   :  { %v859_v30 = vsel %vm857_vm1, %v858_v31, %v856_v34 }
 0x85c   :  { %v873_v25 = vsel %vm872_vm0, %v871_v29, %v859_v30 }
 0x85d   :  { %v888_v38 = vpop.xlane.xlu0 %887  ;;  %v876_v28 = vsel %vm874_vm2, %v875_v35, %v873_v25 }
 0x85e   :  { %v890_v13 = vsel %vm889_vm3, %v888_v38, %v876_v28 }
 0x85f   :  { %v893_v36 = vsel %vm891_vm4, %v892_v37, %v890_v13 }
 0x860   :  { %v907_v44 = vsel %vm906_vm5, %v905_v43, %v893_v36 }
 0x861   :  { %v910_v14 = vsel %vm908_vm6, %v909_v42, %v907_v44 }
 0x8de   :  { %v922_v45 = vpop.xlane.xlu0 %921 }
 0x8df   :  { %v924_v46 = vsel %vm923_vm7, %v922_v45, %v910_v14 }
 0x8e0   :  { %v927_v47 = vsel %vm925_vm8, %v926_v39, %v924_v46 }
 0x8e1   :  { %929 = vst.msk [vmem:[#allocation7] sm:$0xff] %vm928_vm9, %v927_v47 }
 0x8e2   :  { %1069 = shalt.err (!%p1066_p0)
}
 0x8e3   :  { %939 = dma.vmem_to_hbm [thread:$0]  %s937_s2, 128, %s1471_s5, [#allocation4]  }
 0x8e4   :  { %1082 = dma.done.wait [#allocation4], 128  }
 0x8e5   :  { %1083 = vsyncadd [#allocation4], 4294967168 }
 0x8e6   :  { %943 = vsyncpa [#allocation3], 1 }
 0x8e7   :  { %944 = vsyncpa [#allocation6], 1 }
 0x8e8   :  { %945 = vsyncpa [#allocation4], 1 }

</bundles_post_ra>
